<compile_context>
chip_gen: v6e
topology: v6e:2x2x1
jax: 0.10.0
libtpu: 0.0.40
codegen_flags: <defaults>
</compile_context>

<pallas_src>
import functools
import math

import jax
import jax.numpy as jnp
from jax.experimental import pallas as pl
from jax.experimental.pallas import tpu as pltpu

LANES = 128


def _round_up(x, m):
    return ((x + m - 1) // m) * m


def _vmem_limit_bytes():
    """Generation-dependent scoped-VMEM limit (~3/4 of physical, capped)."""
    try:
        cap = pltpu.get_tpu_info().vmem_capacity_bytes
        return int(max(32 << 20, min(cap * 3 // 4, 100 << 20)))
    except Exception:
        return 32 << 20


# ---------------------------------------------------------------------------
# Fused kernel: 3 grid phases over row tiles of the packed patches slab.
# ---------------------------------------------------------------------------
def _gmsff_kernel(p_ref, wd_ref, w3p_ref, bn_ref, o_ref, s_ref,
                  *, n_tiles, tm, m_valid, eps):
    """p_ref   : (M_pad, 128) packed patches, lane = tap*C + cin (resident)
       wd_ref  : (128, 128)   dual-conv weight (cols [0,C)=3x3, [C,2C)=5x5)
       w3p_ref : (128, 128)   1x1 conv over packed concat (cols [12C,13C))
       bn_ref  : (4, 128)     rows: gamma12, beta12, gamma3, beta3 (packed)
       o_ref   : (M_pad, 128) output slab (final channels at lanes [12C,13C))
       s_ref   : (8, 128)     [sum12, sumsq12, scale12, shift12,
                               sum3,  sumsq3,  scale3,  shift3]"""
    i = pl.program_id(0)
    inv_m = 1.0 / m_valid

    @pl.when(i == 0)
    def _init():
        s_ref[...] = jnp.zeros_like(s_ref)

    # ---- phase 1: dual 3x3/5x5 conv (one matmul) + BN batch stats ----------
    @pl.when(i < n_tiles)
    def _phase1():
        r0 = pl.multiple_of(i * tm, tm)
        y = jnp.dot(p_ref[pl.ds(r0, tm), :], wd_ref[...],
                    preferred_element_type=jnp.float32)
        # Padded rows of the patches slab are zero -> contribute zero to both
        # sums, so no row mask is needed in this phase.
        s_ref[0:1, :] += jnp.sum(y, axis=0, keepdims=True)
        s_ref[1:2, :] += jnp.sum(y * y, axis=0, keepdims=True)

    # ---- phase-2 boundary: hoisted BN scale/shift for branches 1 & 2 -------
    @pl.when(i == n_tiles)
    def _finalize12():
        mu = s_ref[0:1, :] * inv_m
        var = jnp.maximum(s_ref[1:2, :] * inv_m - mu * mu, 0.0)
        scale = bn_ref[0:1, :] * jax.lax.rsqrt(var + eps)
        s_ref[2:3, :] = scale
        s_ref[3:4, :] = bn_ref[1:2, :] - mu * scale

    # ---- phase 2: recompute conv, BN+SiLU, 1x1 conv, stats for branch 3 ----
    @pl.when((i >= n_tiles) & (i < 2 * n_tiles))
    def _phase2():
        r0 = pl.multiple_of((i - n_tiles) * tm, tm)
        y = jnp.dot(p_ref[pl.ds(r0, tm), :], wd_ref[...],
                    preferred_element_type=jnp.float32)
        z = y * s_ref[2:3, :] + s_ref[3:4, :]
        a = z * jax.nn.sigmoid(z)                      # SiLU (EUP logistic)
        x4 = jnp.dot(a, w3p_ref[...], preferred_element_type=jnp.float32)
        o_ref[pl.ds(r0, tm), :] = x4
        # Padded rows produce silu(shift) != 0 here -> mask them for stats.
        rows = r0 + jax.lax.broadcasted_iota(jnp.int32, (tm, 1), 0)
        xm = jnp.where(rows < m_valid, x4, 0.0)
        s_ref[4:5, :] += jnp.sum(xm, axis=0, keepdims=True)
        s_ref[5:6, :] += jnp.sum(xm * x4, axis=0, keepdims=True)

    # ---- phase-3 boundary: hoisted BN scale/shift for branch 3 -------------
    @pl.when(i == 2 * n_tiles)
    def _finalize3():
        mu = s_ref[4:5, :] * inv_m
        var = jnp.maximum(s_ref[5:6, :] * inv_m - mu * mu, 0.0)
        scale = bn_ref[2:3, :] * jax.lax.rsqrt(var + eps)
        s_ref[6:7, :] = scale
        s_ref[7:8, :] = bn_ref[3:4, :] - mu * scale

    # ---- phase 3: BN+SiLU of x4 + residual add ------------------------------
    @pl.when(i >= 2 * n_tiles)
    def _phase3():
        r0 = pl.multiple_of((i - 2 * n_tiles) * tm, tm)
        z = o_ref[pl.ds(r0, tm), :] * s_ref[6:7, :] + s_ref[7:8, :]
        # Output channels sit at the center-tap lane offset, so the residual x
        # is exactly the patches tile on those lanes (other lanes discarded).
        o_ref[pl.ds(r0, tm), :] = (z * jax.nn.sigmoid(z)
                                   + p_ref[pl.ds(r0, tm), :])


# ---------------------------------------------------------------------------
# Wrapper
# ---------------------------------------------------------------------------
def gmsff_forward(x_nchw, params, eps=1e-5, tm=128):
    N, C, H, W = x_nchw.shape
    KC = 25 * C
    if KC > LANES:
        # TODO(synk): per-tap matmul fallback for 25*C > 128 (large C).
        raise NotImplementedError("packed-tap GMSFF kernel requires 25*C <= 128")

    M = N * H * W
    M_pad = _round_up(M, tm)
    n_tiles = M_pad // tm
    o_off = 12 * C                      # center-tap lane offset

    # ---- packed patches slab (zero-padded spatially: no tap masks) ---------
    x_nhwc = jnp.transpose(x_nchw, (0, 2, 3, 1)).astype(jnp.float32)
    xp = jnp.pad(x_nhwc, ((0, 0), (2, 2), (2, 2), (0, 0)))
    taps = [xp[:, di:di + H, dj:dj + W, :]
            for di in range(5) for dj in range(5)]
    patches = jnp.stack(taps, axis=3).reshape(M, KC)
    patches = jnp.pad(patches, ((0, M_pad - M), (0, LANES - KC)))

    # ---- packed weights -----------------------------------------------------
    # Dual conv: rows = tap*C + cin; cols [0,C) = conv1 (3x3), [C,2C) = conv2.
    w5 = jnp.transpose(params["w2"], (2, 3, 1, 0)).reshape(KC, C)
    w3 = jnp.pad(jnp.transpose(params["w1"], (2, 3, 1, 0)),
                 ((1, 1), (1, 1), (0, 0), (0, 0))).reshape(KC, C)
    wd = jnp.zeros((LANES, LANES), jnp.float32)
    wd = wd.at[:KC, :C].set(w3).at[:KC, C:2 * C].set(w5)

    # 1x1 conv over the packed concat; outputs at lanes [o_off, o_off+C).
    w1x1 = params["w3"][:, :, 0, 0]                       # (C, 2C)
    w3p = jnp.zeros((LANES, LANES), jnp.float32)
    w3p = w3p.at[:2 * C, o_off:o_off + C].set(w1x1.T)

    # BN gamma/beta, lane-packed (conv biases dropped: they cancel exactly
    # through training-mode batch statistics).
    bn = jnp.zeros((4, LANES), jnp.float32)
    bn = bn.at[0, :C].set(params["g1"]).at[0, C:2 * C].set(params["g2"])
    bn = bn.at[1, :C].set(params["bt1"]).at[1, C:2 * C].set(params["bt2"])
    bn = bn.at[2, o_off:o_off + C].set(params["g3"])
    bn = bn.at[3, o_off:o_off + C].set(params["bt3"])

    def full2d(shape):
        return pl.BlockSpec(shape, lambda i: (0, 0))

    out_slab = pl.pallas_call(
        functools.partial(_gmsff_kernel, n_tiles=n_tiles, tm=tm,
                          m_valid=M, eps=eps),
        out_shape=jax.ShapeDtypeStruct((M_pad, LANES), jnp.float32),
        grid_spec=pltpu.PrefetchScalarGridSpec(
            num_scalar_prefetch=0,
            grid=(3 * n_tiles,),
            in_specs=[
                full2d((M_pad, LANES)),     # packed patches (resident)
                full2d((LANES, LANES)),     # dual-conv weight
                full2d((LANES, LANES)),     # 1x1-conv weight
                full2d((4, LANES)),         # BN gamma/beta (packed)
            ],
            out_specs=full2d((M_pad, LANES)),
            scratch_shapes=[pltpu.VMEM((8, LANES), jnp.float32)],
        ),
        compiler_params=pltpu.CompilerParams(
            # Sequential stats dependency across phases -> 'arbitrary'.
            # TODO(synk): streaming + core-parallel partial stats for v7x.
            dimension_semantics=("arbitrary",),
            vmem_limit_bytes=_vmem_limit_bytes()),
    )(patches, wd, w3p, bn)

    out = out_slab[:M, o_off:o_off + C].reshape(N, H, W, C)
    return jnp.transpose(out, (0, 3, 1, 2))               # back to NCHW


# ---------------------------------------------------------------------------
# Pure-JAX reference (matches PyTorch GMSFF in training mode, conv bias kept).
# ---------------------------------------------------------------------------
def _reference(x, p, eps=1e-5):
    def block(xin, w, b, g, bt, pad):
        y = jax.lax.conv_general_dilated(
            xin, w, window_strides=(1, 1),
            padding=[(pad, pad), (pad, pad)],
            dimension_numbers=("NCHW", "OIHW", "NCHW"))
        y = y + b.reshape(1, -1, 1, 1)
        m = jnp.mean(y, axis=(0, 2, 3), keepdims=True)
        v = jnp.mean((y - m) ** 2, axis=(0, 2, 3), keepdims=True)  # biased var
        z = (y - m) / jnp.sqrt(v + eps) * g.reshape(1, -1, 1, 1) \
            + bt.reshape(1, -1, 1, 1)
        return z * jax.nn.sigmoid(z)                               # SiLU

    x1 = block(x, p["w1"], p["b1"], p["g1"], p["bt1"], 1)
    x2 = block(x, p["w2"], p["b2"], p["g2"], p["bt2"], 2)
    x3 = jnp.concatenate([x1, x2], axis=1)
    x4 = block(x3, p["w3"], p["b3"], p["g3"], p["bt3"], 0)
    return x + x4


if __name__ == "__main__":
    c = 4
    N, H, W = 2, 16, 16

    key = jax.random.PRNGKey(0)
    keys = jax.random.split(key, 13)

    def conv_init(k, c_out, c_in, ksz):
        fan_in = c_in * ksz * ksz
        return jax.random.normal(k, (c_out, c_in, ksz, ksz),
                                 jnp.float32) / math.sqrt(fan_in)

    x = jax.random.normal(keys[0], (N, c, H, W), jnp.float32)
    params = {
        "w1": conv_init(keys[1], c, c, 3),
        "b1": 0.1 * jax.random.normal(keys[2], (c,), jnp.float32),
        "g1": 1.0 + 0.1 * jax.random.normal(keys[3], (c,), jnp.float32),
        "bt1": 0.1 * jax.random.normal(keys[4], (c,), jnp.float32),
        "w2": conv_init(keys[5], c, c, 5),
        "b2": 0.1 * jax.random.normal(keys[6], (c,), jnp.float32),
        "g2": 1.0 + 0.1 * jax.random.normal(keys[7], (c,), jnp.float32),
        "bt2": 0.1 * jax.random.normal(keys[8], (c,), jnp.float32),
        "w3": conv_init(keys[9], c, 2 * c, 1),
        "b3": 0.1 * jax.random.normal(keys[10], (c,), jnp.float32),
        "g3": 1.0 + 0.1 * jax.random.normal(keys[11], (c,), jnp.float32),
        "bt3": 0.1 * jax.random.normal(keys[12], (c,), jnp.float32),
    }

    out = gmsff_forward(x, params)
    out = jax.block_until_ready(out)

    ref = _reference(x, params)
    assert out.shape == (N, c, H, W)
    max_err = float(jnp.max(jnp.abs(out - ref)))
    assert jnp.allclose(out, ref, atol=2e-4, rtol=2e-4), \
        f"mismatch vs reference (max abs err {max_err})"

    print("KERNEL_OK")
</pallas_src>

<mosaic_0001>
module attributes {stable_mosaic.version = 11 : i64} {
  func.func @_gmsff_kernel(%arg0: i32, %arg1: memref<512x128xf32, #tpu.memory_space<vmem>>, %arg2: memref<128x128xf32, #tpu.memory_space<vmem>>, %arg3: memref<128x128xf32, #tpu.memory_space<vmem>>, %arg4: memref<4x128xf32, #tpu.memory_space<vmem>>, %arg5: memref<512x128xf32, #tpu.memory_space<vmem>>, %arg6: memref<8x128xf32, #tpu.memory_space<vmem>>) attributes {dimension_semantics = [#tpu.dimension_semantics<arbitrary>], iteration_bounds = array<i64: 12>, scalar_prefetch = 0 : i64, scratch_operands = 1 : i64, tpu.core_type = #tpu.core_type<tc>, window_params = [{pipeline_mode = #tpu.pipeline_mode<synchronous>, transform_indices = @transform_0, window_bounds = array<i64: 512, 128>}, {pipeline_mode = #tpu.pipeline_mode<synchronous>, transform_indices = @transform_1, window_bounds = array<i64: 128, 128>}, {pipeline_mode = #tpu.pipeline_mode<synchronous>, transform_indices = @transform_2, window_bounds = array<i64: 128, 128>}, {pipeline_mode = #tpu.pipeline_mode<synchronous>, transform_indices = @transform_3, window_bounds = array<i64: 4, 128>}, {pipeline_mode = #tpu.pipeline_mode<synchronous>, transform_indices = @transform_4, window_bounds = array<i64: 512, 128>}]} {
    %c0_i32 = arith.constant 0 : i32
    %0 = arith.cmpi eq, %arg0, %c0_i32 : i32
    %1 = arith.extui %0 : i1 to i32
    %c0_i32_0 = arith.constant 0 : i32
    %2 = arith.cmpi ne, %1, %c0_i32_0 : i32
    scf.if %2 {
      %cst = arith.constant 0.000000e+00 : f32
      %20 = vector.broadcast %cst : f32 to vector<8x128xf32>
      %c0 = arith.constant 0 : index
      %c0_10 = arith.constant 0 : index
      %21 = vector.load %arg6[%c0, %c0_10] : memref<8x128xf32, #tpu.memory_space<vmem>>, vector<8x128xf32>
      tpu.vector_store %arg6[%c0, %c0_10], %20 {strides = array<i32>} : memref<8x128xf32, #tpu.memory_space<vmem>>, vector<8x128xf32>,
    } else {
    }
    %c4_i32 = arith.constant 4 : i32
    %3 = arith.cmpi slt, %arg0, %c4_i32 : i32
    %4 = arith.extui %3 : i1 to i32
    %c0_i32_1 = arith.constant 0 : i32
    %5 = arith.cmpi ne, %4, %c0_i32_1 : i32
    scf.if %5 {
      %c128_i32 = arith.constant 128 : i32
      %20 = arith.muli %arg0, %c128_i32 : i32
      %21 = tpu.assume_multiple %20, 128 : i32
      %22 = arith.index_cast %21 : i32 to index
      %c0 = arith.constant 0 : index
      %23 = vector.load %arg1[%22, %c0] : memref<512x128xf32, #tpu.memory_space<vmem>>, vector<128x128xf32>
      %c0_10 = arith.constant 0 : index
      %c0_11 = arith.constant 0 : index
      %24 = vector.load %arg2[%c0_10, %c0_11] : memref<128x128xf32, #tpu.memory_space<vmem>>, vector<128x128xf32>
      %cst = arith.constant dense<0.000000e+00> : vector<128x128xf32>
      %25 = tpu.matmul %23, %24, %cst {dimension_numbers = #tpu.dot_dimension_numbers<[1], [0], [0], [1], [0, 0, 1, 1], [], []>} : vector<128x128xf32>, vector<128x128xf32>, vector<128x128xf32> -> vector<128x128xf32>
      %c0_12 = arith.constant 0 : index
      %c0_13 = arith.constant 0 : index
      %26 = vector.load %arg6[%c0_12, %c0_13] : memref<8x128xf32, #tpu.memory_space<vmem>>, vector<1x128xf32>
      %cst_14 = arith.constant dense<0.000000e+00> : vector<128xf32>
      %27 = vector.multi_reduction <add>, %25, %cst_14 [0] : vector<128x128xf32> to vector<128xf32>
      %28 = vector.shape_cast %27 : vector<128xf32> to vector<1x128xf32>
      %29 = arith.addf %26, %28 : vector<1x128xf32>
      %c0_15 = arith.constant 0 : index
      %c0_16 = arith.constant 0 : index
      %30 = vector.load %arg6[%c0_15, %c0_16] : memref<8x128xf32, #tpu.memory_space<vmem>>, vector<1x128xf32>
      tpu.vector_store %arg6[%c0_15, %c0_16], %29 {strides = array<i32>} : memref<8x128xf32, #tpu.memory_space<vmem>>, vector<1x128xf32>,
      %c1 = arith.constant 1 : index
      %c0_17 = arith.constant 0 : index
      %31 = vector.load %arg6[%c1, %c0_17] : memref<8x128xf32, #tpu.memory_space<vmem>>, vector<1x128xf32>
      %32 = arith.mulf %25, %25 : vector<128x128xf32>
      %cst_18 = arith.constant dense<0.000000e+00> : vector<128xf32>
      %33 = vector.multi_reduction <add>, %32, %cst_18 [0] : vector<128x128xf32> to vector<128xf32>
      %34 = vector.shape_cast %33 : vector<128xf32> to vector<1x128xf32>
      %35 = arith.addf %31, %34 : vector<1x128xf32>
      %c1_19 = arith.constant 1 : index
      %c0_20 = arith.constant 0 : index
      %36 = vector.load %arg6[%c1_19, %c0_20] : memref<8x128xf32, #tpu.memory_space<vmem>>, vector<1x128xf32>
      tpu.vector_store %arg6[%c1_19, %c0_20], %35 {strides = array<i32>} : memref<8x128xf32, #tpu.memory_space<vmem>>, vector<1x128xf32>,
    } else {
    }
    %c4_i32_2 = arith.constant 4 : i32
    %6 = arith.cmpi eq, %arg0, %c4_i32_2 : i32
    %7 = arith.extui %6 : i1 to i32
    %c0_i32_3 = arith.constant 0 : i32
    %8 = arith.cmpi ne, %7, %c0_i32_3 : i32
    scf.if %8 {
      %c0 = arith.constant 0 : index
      %c0_10 = arith.constant 0 : index
      %20 = vector.load %arg6[%c0, %c0_10] : memref<8x128xf32, #tpu.memory_space<vmem>>, vector<1x128xf32>
      %cst = arith.constant 0.001953125 : f32
      %21 = vector.broadcast %cst : f32 to vector<1x128xf32>
      %22 = arith.mulf %20, %21 : vector<1x128xf32>
      %c1 = arith.constant 1 : index
      %c0_11 = arith.constant 0 : index
      %23 = vector.load %arg6[%c1, %c0_11] : memref<8x128xf32, #tpu.memory_space<vmem>>, vector<1x128xf32>
      %cst_12 = arith.constant 0.001953125 : f32
      %24 = vector.broadcast %cst_12 : f32 to vector<1x128xf32>
      %25 = arith.mulf %23, %24 : vector<1x128xf32>
      %26 = arith.mulf %22, %22 : vector<1x128xf32>
      %27 = arith.subf %25, %26 : vector<1x128xf32>
      %cst_13 = arith.constant 0.000000e+00 : f32
      %28 = vector.broadcast %cst_13 : f32 to vector<1x128xf32>
      %29 = arith.maximumf %27, %28 : vector<1x128xf32>
      %c0_14 = arith.constant 0 : index
      %c0_15 = arith.constant 0 : index
      %30 = vector.load %arg4[%c0_14, %c0_15] : memref<4x128xf32, #tpu.memory_space<vmem>>, vector<1x128xf32>
      %cst_16 = arith.constant 9.99999974E-6 : f32
      %31 = vector.broadcast %cst_16 : f32 to vector<1x128xf32>
      %32 = arith.addf %29, %31 : vector<1x128xf32>
      %33 = math.rsqrt %32 : vector<1x128xf32>
      %34 = arith.mulf %30, %33 : vector<1x128xf32>
      %c2 = arith.constant 2 : index
      %c0_17 = arith.constant 0 : index
      %35 = vector.load %arg6[%c2, %c0_17] : memref<8x128xf32, #tpu.memory_space<vmem>>, vector<1x128xf32>
      tpu.vector_store %arg6[%c2, %c0_17], %34 {strides = array<i32>} : memref<8x128xf32, #tpu.memory_space<vmem>>, vector<1x128xf32>,
      %c1_18 = arith.constant 1 : index
      %c0_19 = arith.constant 0 : index
      %36 = vector.load %arg4[%c1_18, %c0_19] : memref<4x128xf32, #tpu.memory_space<vmem>>, vector<1x128xf32>
      %37 = arith.mulf %22, %34 : vector<1x128xf32>
      %38 = arith.subf %36, %37 : vector<1x128xf32>
      %c3 = arith.constant 3 : index
      %c0_20 = arith.constant 0 : index
      %39 = vector.load %arg6[%c3, %c0_20] : memref<8x128xf32, #tpu.memory_space<vmem>>, vector<1x128xf32>
      tpu.vector_store %arg6[%c3, %c0_20], %38 {strides = array<i32>} : memref<8x128xf32, #tpu.memory_space<vmem>>, vector<1x128xf32>,
    } else {
    }
    %c4_i32_4 = arith.constant 4 : i32
    %9 = arith.cmpi sge, %arg0, %c4_i32_4 : i32
    %c8_i32 = arith.constant 8 : i32
    %10 = arith.cmpi slt, %arg0, %c8_i32 : i32
    %11 = arith.andi %9, %10 : i1
    %12 = arith.extui %11 : i1 to i32
    %c0_i32_5 = arith.constant 0 : i32
    %13 = arith.cmpi ne, %12, %c0_i32_5 : i32
    scf.if %13 {
      %c4_i32_10 = arith.constant 4 : i32
      %20 = arith.subi %arg0, %c4_i32_10 : i32
      %c128_i32 = arith.constant 128 : i32
      %21 = arith.muli %20, %c128_i32 : i32
      %22 = tpu.assume_multiple %21, 128 : i32
      %23 = arith.index_cast %22 : i32 to index
      %c0 = arith.constant 0 : index
      %24 = vector.load %arg1[%23, %c0] : memref<512x128xf32, #tpu.memory_space<vmem>>, vector<128x128xf32>
      %c0_11 = arith.constant 0 : index
      %c0_12 = arith.constant 0 : index
      %25 = vector.load %arg2[%c0_11, %c0_12] : memref<128x128xf32, #tpu.memory_space<vmem>>, vector<128x128xf32>
      %cst = arith.constant dense<0.000000e+00> : vector<128x128xf32>
      %26 = tpu.matmul %24, %25, %cst {dimension_numbers = #tpu.dot_dimension_numbers<[1], [0], [0], [1], [0, 0, 1, 1], [], []>} : vector<128x128xf32>, vector<128x128xf32>, vector<128x128xf32> -> vector<128x128xf32>
      %c2 = arith.constant 2 : index
      %c0_13 = arith.constant 0 : index
      %27 = vector.load %arg6[%c2, %c0_13] : memref<8x128xf32, #tpu.memory_space<vmem>>, vector<1x128xf32>
      %28 = vector.broadcast %27 : vector<1x128xf32> to vector<128x128xf32>
      %29 = arith.mulf %26, %28 : vector<128x128xf32>
      %c3 = arith.constant 3 : index
      %c0_14 = arith.constant 0 : index
      %30 = vector.load %arg6[%c3, %c0_14] : memref<8x128xf32, #tpu.memory_space<vmem>>, vector<1x128xf32>
      %31 = vector.broadcast %30 : vector<1x128xf32> to vector<128x128xf32>
      %32 = arith.addf %29, %31 : vector<128x128xf32>
      %33 = arith.negf %32 : vector<128x128xf32>
      %34 = math.exp %33 : vector<128x128xf32>
      %cst_15 = arith.constant 1.000000e+00 : f32
      %35 = vector.broadcast %cst_15 : f32 to vector<128x128xf32>
      %36 = arith.addf %35, %34 : vector<128x128xf32>
      %37 = arith.divf %35, %36 : vector<128x128xf32>
      %38 = arith.mulf %32, %37 : vector<128x128xf32>
      %c0_16 = arith.constant 0 : index
      %c0_17 = arith.constant 0 : index
      %39 = vector.load %arg3[%c0_16, %c0_17] : memref<128x128xf32, #tpu.memory_space<vmem>>, vector<128x128xf32>
      %cst_18 = arith.constant dense<0.000000e+00> : vector<128x128xf32>
      %40 = tpu.matmul %38, %39, %cst_18 {dimension_numbers = #tpu.dot_dimension_numbers<[1], [0], [0], [1], [0, 0, 1, 1], [], []>} : vector<128x128xf32>, vector<128x128xf32>, vector<128x128xf32> -> vector<128x128xf32>
      %41 = arith.index_cast %22 : i32 to index
      %c0_19 = arith.constant 0 : index
      %42 = vector.load %arg5[%41, %c0_19] : memref<512x128xf32, #tpu.memory_space<vmem>>, vector<128x128xf32>
      tpu.vector_store %arg5[%41, %c0_19], %40 {strides = array<i32>} : memref<512x128xf32, #tpu.memory_space<vmem>>, vector<128x128xf32>,
      %43 = tpu.iota {dimensions = array<i32: 0>} : vector<128x1xi32>
      %44 = vector.broadcast %22 : i32 to vector<128x1xi32>
      %45 = arith.addi %44, %43 : vector<128x1xi32>
      %c512_i32 = arith.constant 512 : i32
      %46 = vector.broadcast %c512_i32 : i32 to vector<128x1xi32>
      %47 = arith.cmpi slt, %45, %46 : vector<128x1xi32>
      %cst_20 = arith.constant 0.000000e+00 : f32
      %48 = vector.shape_cast %47 : vector<128x1xi1> to vector<128x1xi1>
      %49 = vector.broadcast %48 : vector<128x1xi1> to vector<128x128xi1>
      %50 = vector.broadcast %cst_20 : f32 to vector<128x128xf32>
      %51 = arith.select %49, %40, %50 : vector<128x128xi1>, vector<128x128xf32>
      %c4 = arith.constant 4 : index
      %c0_21 = arith.constant 0 : index
      %52 = vector.load %arg6[%c4, %c0_21] : memref<8x128xf32, #tpu.memory_space<vmem>>, vector<1x128xf32>
      %cst_22 = arith.constant dense<0.000000e+00> : vector<128xf32>
      %53 = vector.multi_reduction <add>, %51, %cst_22 [0] : vector<128x128xf32> to vector<128xf32>
      %54 = vector.shape_cast %53 : vector<128xf32> to vector<1x128xf32>
      %55 = arith.addf %52, %54 : vector<1x128xf32>
      %c4_23 = arith.constant 4 : index
      %c0_24 = arith.constant 0 : index
      %56 = vector.load %arg6[%c4_23, %c0_24] : memref<8x128xf32, #tpu.memory_space<vmem>>, vector<1x128xf32>
      tpu.vector_store %arg6[%c4_23, %c0_24], %55 {strides = array<i32>} : memref<8x128xf32, #tpu.memory_space<vmem>>, vector<1x128xf32>,
      %c5 = arith.constant 5 : index
      %c0_25 = arith.constant 0 : index
      %57 = vector.load %arg6[%c5, %c0_25] : memref<8x128xf32, #tpu.memory_space<vmem>>, vector<1x128xf32>
      %58 = arith.mulf %51, %40 : vector<128x128xf32>
      %cst_26 = arith.constant dense<0.000000e+00> : vector<128xf32>
      %59 = vector.multi_reduction <add>, %58, %cst_26 [0] : vector<128x128xf32> to vector<128xf32>
      %60 = vector.shape_cast %59 : vector<128xf32> to vector<1x128xf32>
      %61 = arith.addf %57, %60 : vector<1x128xf32>
      %c5_27 = arith.constant 5 : index
      %c0_28 = arith.constant 0 : index
      %62 = vector.load %arg6[%c5_27, %c0_28] : memref<8x128xf32, #tpu.memory_space<vmem>>, vector<1x128xf32>
      tpu.vector_store %arg6[%c5_27, %c0_28], %61 {strides = array<i32>} : memref<8x128xf32, #tpu.memory_space<vmem>>, vector<1x128xf32>,
    } else {
    }
    %c8_i32_6 = arith.constant 8 : i32
    %14 = arith.cmpi eq, %arg0, %c8_i32_6 : i32
    %15 = arith.extui %14 : i1 to i32
    %c0_i32_7 = arith.constant 0 : i32
    %16 = arith.cmpi ne, %15, %c0_i32_7 : i32
    scf.if %16 {
      %c4 = arith.constant 4 : index
      %c0 = arith.constant 0 : index
      %20 = vector.load %arg6[%c4, %c0] : memref<8x128xf32, #tpu.memory_space<vmem>>, vector<1x128xf32>
      %cst = arith.constant 0.001953125 : f32
      %21 = vector.broadcast %cst : f32 to vector<1x128xf32>
      %22 = arith.mulf %20, %21 : vector<1x128xf32>
      %c5 = arith.constant 5 : index
      %c0_10 = arith.constant 0 : index
      %23 = vector.load %arg6[%c5, %c0_10] : memref<8x128xf32, #tpu.memory_space<vmem>>, vector<1x128xf32>
      %cst_11 = arith.constant 0.001953125 : f32
      %24 = vector.broadcast %cst_11 : f32 to vector<1x128xf32>
      %25 = arith.mulf %23, %24 : vector<1x128xf32>
      %26 = arith.mulf %22, %22 : vector<1x128xf32>
      %27 = arith.subf %25, %26 : vector<1x128xf32>
      %cst_12 = arith.constant 0.000000e+00 : f32
      %28 = vector.broadcast %cst_12 : f32 to vector<1x128xf32>
      %29 = arith.maximumf %27, %28 : vector<1x128xf32>
      %c2 = arith.constant 2 : index
      %c0_13 = arith.constant 0 : index
      %30 = vector.load %arg4[%c2, %c0_13] : memref<4x128xf32, #tpu.memory_space<vmem>>, vector<1x128xf32>
      %cst_14 = arith.constant 9.99999974E-6 : f32
      %31 = vector.broadcast %cst_14 : f32 to vector<1x128xf32>
      %32 = arith.addf %29, %31 : vector<1x128xf32>
      %33 = math.rsqrt %32 : vector<1x128xf32>
      %34 = arith.mulf %30, %33 : vector<1x128xf32>
      %c6 = arith.constant 6 : index
      %c0_15 = arith.constant 0 : index
      %35 = vector.load %arg6[%c6, %c0_15] : memref<8x128xf32, #tpu.memory_space<vmem>>, vector<1x128xf32>
      tpu.vector_store %arg6[%c6, %c0_15], %34 {strides = array<i32>} : memref<8x128xf32, #tpu.memory_space<vmem>>, vector<1x128xf32>,
      %c3 = arith.constant 3 : index
      %c0_16 = arith.constant 0 : index
      %36 = vector.load %arg4[%c3, %c0_16] : memref<4x128xf32, #tpu.memory_space<vmem>>, vector<1x128xf32>
      %37 = arith.mulf %22, %34 : vector<1x128xf32>
      %38 = arith.subf %36, %37 : vector<1x128xf32>
      %c7 = arith.constant 7 : index
      %c0_17 = arith.constant 0 : index
      %39 = vector.load %arg6[%c7, %c0_17] : memref<8x128xf32, #tpu.memory_space<vmem>>, vector<1x128xf32>
      tpu.vector_store %arg6[%c7, %c0_17], %38 {strides = array<i32>} : memref<8x128xf32, #tpu.memory_space<vmem>>, vector<1x128xf32>,
    } else {
    }
    %c8_i32_8 = arith.constant 8 : i32
    %17 = arith.cmpi sge, %arg0, %c8_i32_8 : i32
    %18 = arith.extui %17 : i1 to i32
    %c0_i32_9 = arith.constant 0 : i32
    %19 = arith.cmpi ne, %18, %c0_i32_9 : i32
    scf.if %19 {
      %c8_i32_10 = arith.constant 8 : i32
      %20 = arith.subi %arg0, %c8_i32_10 : i32
      %c128_i32 = arith.constant 128 : i32
      %21 = arith.muli %20, %c128_i32 : i32
      %22 = tpu.assume_multiple %21, 128 : i32
      %23 = arith.index_cast %22 : i32 to index
      %c0 = arith.constant 0 : index
      %24 = vector.load %arg5[%23, %c0] : memref<512x128xf32, #tpu.memory_space<vmem>>, vector<128x128xf32>
      %c6 = arith.constant 6 : index
      %c0_11 = arith.constant 0 : index
      %25 = vector.load %arg6[%c6, %c0_11] : memref<8x128xf32, #tpu.memory_space<vmem>>, vector<1x128xf32>
      %26 = vector.broadcast %25 : vector<1x128xf32> to vector<128x128xf32>
      %27 = arith.mulf %24, %26 : vector<128x128xf32>
      %c7 = arith.constant 7 : index
      %c0_12 = arith.constant 0 : index
      %28 = vector.load %arg6[%c7, %c0_12] : memref<8x128xf32, #tpu.memory_space<vmem>>, vector<1x128xf32>
      %29 = vector.broadcast %28 : vector<1x128xf32> to vector<128x128xf32>
      %30 = arith.addf %27, %29 : vector<128x128xf32>
      %31 = arith.negf %30 : vector<128x128xf32>
      %32 = math.exp %31 : vector<128x128xf32>
      %cst = arith.constant 1.000000e+00 : f32
      %33 = vector.broadcast %cst : f32 to vector<128x128xf32>
      %34 = arith.addf %33, %32 : vector<128x128xf32>
      %35 = arith.divf %33, %34 : vector<128x128xf32>
      %36 = arith.mulf %30, %35 : vector<128x128xf32>
      %37 = arith.index_cast %22 : i32 to index
      %c0_13 = arith.constant 0 : index
      %38 = vector.load %arg1[%37, %c0_13] : memref<512x128xf32, #tpu.memory_space<vmem>>, vector<128x128xf32>
      %39 = arith.addf %36, %38 : vector<128x128xf32>
      %40 = arith.index_cast %22 : i32 to index
      %c0_14 = arith.constant 0 : index
      %41 = vector.load %arg5[%40, %c0_14] : memref<512x128xf32, #tpu.memory_space<vmem>>, vector<128x128xf32>
      tpu.vector_store %arg5[%40, %c0_14], %39 {strides = array<i32>} : memref<512x128xf32, #tpu.memory_space<vmem>>, vector<128x128xf32>,
    } else {
    }
    return
  }
  func.func @transform_0(%arg0: i32) -> (i32, i32) {
    %c0_i32 = arith.constant 0 : i32
    %c0_i32_0 = arith.constant 0 : i32
    %c0_i32_1 = arith.constant 0 : i32
    return %c0_i32, %c0_i32_0 : i32, i32
  }
  func.func @transform_1(%arg0: i32) -> (i32, i32) {
    %c0_i32 = arith.constant 0 : i32
    %c0_i32_0 = arith.constant 0 : i32
    %c0_i32_1 = arith.constant 0 : i32
    return %c0_i32, %c0_i32_0 : i32, i32
  }
  func.func @transform_2(%arg0: i32) -> (i32, i32) {
    %c0_i32 = arith.constant 0 : i32
    %c0_i32_0 = arith.constant 0 : i32
    %c0_i32_1 = arith.constant 0 : i32
    return %c0_i32, %c0_i32_0 : i32, i32
  }
  func.func @transform_3(%arg0: i32) -> (i32, i32) {
    %c0_i32 = arith.constant 0 : i32
    %c0_i32_0 = arith.constant 0 : i32
    %c0_i32_1 = arith.constant 0 : i32
    return %c0_i32, %c0_i32_0 : i32, i32
  }
  func.func @transform_4(%arg0: i32) -> (i32, i32) {
    %c0_i32 = arith.constant 0 : i32
    %c0_i32_0 = arith.constant 0 : i32
    %c0_i32_1 = arith.constant 0 : i32
    return %c0_i32, %c0_i32_0 : i32, i32
  }
}

</mosaic_0001>

<bundles_post_ra>
// kernel: tpu_custom_call.1
= control target key start
LH: loop header
LB: loop body
LE: loop exit
PB: predicated region body
PF: predicated region fallthrough
CT: control target
= control target key end

     0   :  { %9 = vsyncpa [#allocation4], 0  ;;  %s2646_s0 = inlined_call_operand.hbm [shape: f32[512,128], index: 0, kind: input, shape index: {}]   ;;  %s2647_s1 = inlined_call_operand.hbm [shape: f32[128,128], index: 1, kind: input, shape index: {}]   ;;  %s2648_s2 = inlined_call_operand.hbm [shape: f32[128,128], index: 2, kind: input, shape index: {}]   ;;  %s2649_s3 = inlined_call_operand.vmem [shape: f32[4,128], index: 3, kind: input, shape index: {}]   ;;  %s2650_s4 = inlined_call_operand.hbm [shape: f32[512,128], index: 4, kind: output, shape index: {}]  }
   0x1   :  { %10 = vsyncpa [#allocation7], 0 }
   0x2   :  { %11 = vsyncpa [#allocation5], 0  ;;  %s2177_s15 = smov 0  }
   0x3 LB: > { %s2183_s16 = sadd.s32 4294967295, %s2141_s15   ;;  %p1484_p0 = scmp.ge.s32.totalorder %s2141_s15, 1  ;;  %s2141_s15 = sphi %s2177_s15, %s17_s15  }
   0x4   : > { %p127_p1 = scmp.lt.s32.totalorder %s2141_s15, 13  ;;  %p1864_p3 = scmp.eq.s32.totalorder %s2183_s16, 0 }
   0x5   : > { %s2143_s18 = smov [#allocation6]   ;;  %s2144_s20 = smov [#allocation3]  }
   0x6   : > { %p2189_p4 = pnand %p1484_p0, %p127_p1  ;;  %s152_s19 = sshll.u32 %s2143_s18, 4  ;;  %s153_s19 = int_to_ptr.vmem [resolvable:$true] %s152_s19 }
   0x7   : > { %s139_s21 = sshll.u32 %s2144_s20, 4  ;;  %s2145_s23 = smov [#allocation8]   ;;  %s140_s21 = int_to_ptr.vmem [resolvable:$true] %s139_s21 }
   0x8   : > { %p1854_p5 = pneg %p2189_p4  ;;  %s165_s24 = sshll.u32 %s2145_s23, 4  ;;  %s2201_s24 = int_to_ptr.vmem [resolvable:$true] %s165_s24 }
   0x9   : > { %s2032_s25 = scalar_lea.vmem %s153_s19, 2048  ;;  %p2040_p11 = scmp.lt.s32.totalorder %s153_s19, %s153_s19 }
   0xa   : > { %p2197_p6 = pnand %p1864_p3, %p1854_p5  ;;  %p2033_p8 = scmp.ne.s32.totalorder %s153_s19, %s2032_s25 }
   0xb   : > { %p2041_p12 = scmp.lt.s32.totalorder %s2032_s25, %s2032_s25 }
   0xc   : > { %p2023_p7 = pneg %p2197_p6 }
   0xd   : > { %p2042_p13 = por %p2041_p12, %p2040_p11 }
   0xe   : > { %p2035_p9 = pnand %p2033_p8, %p2023_p7 }
  0x10   : > { %p2036_p10 = pneg %p2035_p9 }
  0x12   : > { %p2043_p0 = pnand %p2042_p13, %p2036_p10 }
  0x14   : > { %2046 = shalt.err (!%p2043_p0)
}
  0x15   : > { %s2146_s26 = smov 128   ;;  %s2147_s27 = smov 8  }
  0x16   : > { %1860 = dma.hbm_to_vmem [thread:$0]  (!%p2197_p6), %s2647_s1, 2048, %s153_s19, [#allocation7], %s2146_s26, %s2146_s26, %s2147_s27  }
  0x17   : > { %s2058_s30 = scalar_lea.vmem %s140_s21, 8192  ;;  %p2066_p9 = scmp.lt.s32.totalorder %s140_s21, %s140_s21 }
  0x18   : > { %p2059_p1 = scmp.ne.s32.totalorder %s140_s21, %s2058_s30  ;;  %p2067_p2 = scmp.lt.s32.totalorder %s2058_s30, %s2058_s30 }
  0x1a   : > { %p2061_p5 = pnand %p2059_p1, %p2023_p7  ;;  %p2068_p11 = por %p2067_p2, %p2066_p9 }
  0x1c   : > { %p2062_p8 = pneg %p2061_p5 }
  0x1e   : > { %p2069_p10 = pnand %p2068_p11, %p2062_p8 }
  0x20   : > { %2072 = shalt.err (!%p2069_p10)
}
  0x21   : > { %1857 = dma.hbm_to_vmem [thread:$0]  (!%p2197_p6), %s2646_s0, 8192, %s140_s21, [#allocation4], %s2146_s26, %s2146_s26, %s2147_s27  }
  0x22   : > { %s2084_s7 = scalar_lea.vmem %s2201_s24, 2048  ;;  %p2092_p2 = scmp.lt.s32.totalorder %s2201_s24, %s2201_s24 }
  0x23   : > { %p2085_p12 = scmp.ne.s32.totalorder %s2201_s24, %s2084_s7  ;;  %p2093_p1 = scmp.lt.s32.totalorder %s2084_s7, %s2084_s7 }
  0x25   : > { %p2087_p13 = pnand %p2085_p12, %p2023_p7  ;;  %p2094_p5 = por %p2093_p1, %p2092_p2 }
  0x27   : > { %p2088_p0 = pneg %p2087_p13 }
  0x29   : > { %p2095_p8 = pnand %p2094_p5, %p2088_p0 }
  0x2b   : > { %2098 = shalt.err (!%p2095_p8)
}
  0x2c   : > { %1863 = dma.hbm_to_vmem [thread:$0]  (!%p2197_p6), %s2648_s2, 2048, %s2201_s24, [#allocation7], %s2146_s26, %s2146_s26, %s2147_s27  }
  0x2d   : > { %184 = sbr.rel (%p2189_p4) target bundleno = 1025 (0x401), region = 36 }
  0x32   : > { %2128 = dma.done.wait (%p1864_p3), [#allocation4], 8192  }
  0x33   : > { %2130 = vsyncadd (%p1864_p3), [#allocation4], 4294959104 }
  0x34   : > { %2132 = dma.done.wait (%p1864_p3), [#allocation7], 4096  }
  0x35   : > { %2134 = vsyncadd (%p1864_p3), [#allocation7], 4294963200  ;;  %p2653_p7 = scmp.ne.s32.totalorder %s2183_s16, 0 }
  0x37   : > { %211 = sbr.rel (%p2653_p7) target bundleno = 62 (0x3e), region = 52 }
  0x3c   : > { %v2148_v0 = vmov 0.0  }
  0x3d   : > { %212 = vst [vmem:[#allocation2] sm:$0xff] %v2148_v0 }
  0x3e PF: > { %p1493_p4 = scmp.ge.s32.totalorder %s2183_s16, 4 }
  0x3f   : > { %s1494_s10 = sshll.u32 (!%p1493_p4), %s2183_s16, 7 }
  0x40   : > { %216 = sbr.rel (%p1493_p4) target bundleno = 346 (0x15a), region = 56  ;;  %s2250_s11 = scalar_lea.vmem (!%p1493_p4), [#allocation3], %s1494_s10 }
  0x45   : > { %v250_v1 = vld [vmem:[#allocation6 + $0x78] sm:$0xff]  ;;  %v249_v2 = vld [vmem:[#allocation6 + $0x70] sm:$0xff]  ;;  %v248_v3 = vld [vmem:[#allocation6 + $0x68] sm:$0xff] }
  0x46   : > { %1638 = vmatprep.subr.mxu0 %v250_v1  ;;  %1806 = vmatprep.subr.mxu1 %v250_v1  ;;  %v247_v4 = vld [vmem:[#allocation6 + $0x60] sm:$0xff]  ;;  %v246_v5 = vld [vmem:[#allocation6 + $0x58] sm:$0xff]  ;;  %v245_v6 = vld [vmem:[#allocation6 + $0x50] sm:$0xff] }
  0x47   : > { %1639 = vmatpush3.msra.mxu0 %v250_v1  ;;  %1822 = vmatpush3.msra.mxu1 %v250_v1  ;;  %v244_v7 = vld [vmem:[#allocation6 + $0x48] sm:$0xff]  ;;  %v243_v8 = vld [vmem:[#allocation6 + $0x40] sm:$0xff]  ;;  %v242_v9 = vld [vmem:[#allocation6 + $0x38] sm:$0xff] }
  0x48   : > { %1640 = vmatprep.subr.mxu0 %v249_v2  ;;  %1807 = vmatprep.subr.mxu1 %v249_v2  ;;  %v241_v10 = vld [vmem:[#allocation6 + $0x30] sm:$0xff]  ;;  %v219_v11 = vld [vmem:[%s2250_s11] sm:$0xff]  ;;  %v240_v12 = vld [vmem:[#allocation6 + $0x28] sm:$0xff] }
  0x49   : > { %1641 = vmatpush3.msra.mxu0 %v249_v2  ;;  %1823 = vmatpush3.msra.mxu1 %v249_v2  ;;  %v239_v13 = vld [vmem:[#allocation6 + $0x20] sm:$0xff]  ;;  %v238_v14 = vld [vmem:[#allocation6 + $0x18] sm:$0xff]  ;;  %v237_v15 = vld [vmem:[#allocation6 + $0x10] sm:$0xff] }
  0x4a   : > { %1642 = vmatprep.subr.mxu0 %v248_v3  ;;  %1808 = vmatprep.subr.mxu1 %v248_v3  ;;  %v236_v16 = vld [vmem:[#allocation6 + $0x8] sm:$0xff]  ;;  %v235_v17 = vld [vmem:[#allocation6] sm:$0xff]  ;;  %v227_v20 = vld [vmem:[%s2250_s11 + $0x40] sm:$0xff] }
  0x4b   : > { %1643 = vmatpush3.msra.mxu0 %v248_v3  ;;  %1824 = vmatpush3.msra.mxu1 %v248_v3  ;;  %v220_v18 = vld [vmem:[%s2250_s11 + $0x8] sm:$0xff]  ;;  %v221_v19 = vld [vmem:[%s2250_s11 + $0x10] sm:$0xff]  ;;  %v222_v23 = vld [vmem:[%s2250_s11 + $0x18] sm:$0xff] }
  0x4c   : > { %1644 = vmatprep.subr.mxu0 %v247_v4  ;;  %1809 = vmatprep.subr.mxu1 %v247_v4  ;;  %v228_v21 = vld [vmem:[%s2250_s11 + $0x48] sm:$0xff]  ;;  %v229_v22 = vld [vmem:[%s2250_s11 + $0x50] sm:$0xff]  ;;  %v223_v24 = vld [vmem:[%s2250_s11 + $0x20] sm:$0xff] }
  0x4d   : > { %1645 = vmatpush3.msra.mxu0 %v247_v4  ;;  %1825 = vmatpush3.msra.mxu1 %v247_v4  ;;  %v230_v25 = vld [vmem:[%s2250_s11 + $0x58] sm:$0xff]  ;;  %v231_v26 = vld [vmem:[%s2250_s11 + $0x60] sm:$0xff]  ;;  %v224_v27 = vld [vmem:[%s2250_s11 + $0x28] sm:$0xff] }
  0x4e   : > { %1646 = vmatprep.subr.mxu0 %v246_v5  ;;  %1810 = vmatprep.subr.mxu1 %v246_v5  ;;  %v225_v28 = vld [vmem:[%s2250_s11 + $0x30] sm:$0xff]  ;;  %v232_v29 = vld [vmem:[%s2250_s11 + $0x68] sm:$0xff]  ;;  %v226_v31 = vld [vmem:[%s2250_s11 + $0x38] sm:$0xff] }
  0x4f   : > { %1647 = vmatpush3.msra.mxu0 %v246_v5  ;;  %1826 = vmatpush3.msra.mxu1 %v246_v5  ;;  %v233_v30 = vld [vmem:[%s2250_s11 + $0x70] sm:$0xff]  ;;  %v234_v32 = vld [vmem:[%s2250_s11 + $0x78] sm:$0xff] }
  0x50   : > { %1648 = vmatprep.subr.mxu0 %v245_v6  ;;  %1811 = vmatprep.subr.mxu1 %v245_v6 }
  0x51   : > { %1649 = vmatpush3.msra.mxu0 %v245_v6  ;;  %1827 = vmatpush3.msra.mxu1 %v245_v6 }
  0x52   : > { %1650 = vmatprep.subr.mxu0 %v244_v7  ;;  %1812 = vmatprep.subr.mxu1 %v244_v7 }
  0x53   : > { %1651 = vmatpush3.msra.mxu0 %v244_v7  ;;  %1828 = vmatpush3.msra.mxu1 %v244_v7 }
  0x54   : > { %1652 = vmatprep.subr.mxu0 %v243_v8  ;;  %1813 = vmatprep.subr.mxu1 %v243_v8 }
  0x55   : > { %1653 = vmatpush3.msra.mxu0 %v243_v8  ;;  %1829 = vmatpush3.msra.mxu1 %v243_v8 }
  0x56   : > { %1654 = vmatprep.subr.mxu0 %v242_v9  ;;  %1814 = vmatprep.subr.mxu1 %v242_v9 }
  0x57   : > { %1655 = vmatpush3.msra.mxu0 %v242_v9  ;;  %1830 = vmatpush3.msra.mxu1 %v242_v9 }
  0x58   : > { %1656 = vmatprep.subr.mxu0 %v241_v10  ;;  %1670 = vmatprep.mubr.f32.mxu0 %v219_v11 }
  0x59   : > { %1657 = vmatpush3.msra.mxu0 %v241_v10  ;;  %1815 = vmatprep.subr.mxu1 %v241_v10 }
  0x5a   : > { %1658 = vmatprep.subr.mxu0 %v240_v12  ;;  %1831 = vmatpush3.msra.mxu1 %v241_v10 }
  0x5b   : > { %1659 = vmatpush3.msra.mxu0 %v240_v12  ;;  %1816 = vmatprep.subr.mxu1 %v240_v12 }
  0x5c   : > { %1660 = vmatprep.subr.mxu0 %v239_v13  ;;  %1832 = vmatpush3.msra.mxu1 %v240_v12 }
  0x5d   : > { %1661 = vmatpush3.msra.mxu0 %v239_v13  ;;  %1817 = vmatprep.subr.mxu1 %v239_v13 }
  0x5e   : > { %1662 = vmatprep.subr.mxu0 %v238_v14  ;;  %1833 = vmatpush3.msra.mxu1 %v239_v13 }
  0x5f   : > { %1663 = vmatpush3.msra.mxu0 %v238_v14  ;;  %1818 = vmatprep.subr.mxu1 %v238_v14 }
  0x60   : > { %1664 = vmatprep.subr.mxu0 %v237_v15  ;;  %1834 = vmatpush3.msra.mxu1 %v238_v14 }
  0x61   : > { %1665 = vmatpush3.msra.mxu0 %v237_v15  ;;  %1819 = vmatprep.subr.mxu1 %v237_v15 }
  0x62   : > { %1666 = vmatprep.subr.mxu0 %v236_v16  ;;  %1835 = vmatpush3.msra.mxu1 %v237_v15 }
  0x63   : > { %1667 = vmatpush3.msra.mxu0 %v236_v16  ;;  %1820 = vmatprep.subr.mxu1 %v236_v16 }
  0x64   : > { %1668 = vmatprep.subr.mxu0 %v235_v17  ;;  %1836 = vmatpush3.msra.mxu1 %v236_v16 }
  0x65   : > { %1669 = vmatpush3.msra.mxu0 %v235_v17  ;;  %1821 = vmatprep.subr.mxu1 %v235_v17 }
  0x66   : > { %1671 = vmatmul.mubr.f32.vlgmr.msra.gmra.mxu0 %v220_v18  ;;  %1837 = vmatpush3.msra.mxu1 %v235_v17 }
  0x67   : > { %1673 = vmatprep.mubr.f32.mxu0 %v221_v19  ;;  %1682 = vmatprep.mubr.f32.mxu1 %v227_v20 }
  0x68   : > { %1683 = vmatmul.mubr.f32.vlgmr.msra.gmra.mxu1 %v228_v21 }
  0x69   : > { %1685 = vmatprep.mubr.f32.mxu1 %v229_v22 }
  0x6a   : > { %1674 = vmatmul.mubr.f32.gmra.mxu0 %v222_v23 }
  0x6b   : > { %1676 = vmatprep.mubr.f32.mxu0 %v223_v24 }
  0x6c   : > { %1686 = vmatmul.mubr.f32.gmra.mxu1 %v230_v25 }
  0x6d   : > { %1688 = vmatprep.mubr.f32.mxu1 %v231_v26 }
  0x6e   : > { %1677 = vmatmul.mubr.f32.gmra.mxu0 %v224_v27 }
  0x6f   : > { %1679 = vmatprep.mubr.f32.mxu0 %v225_v28 }
  0x70   : > { %1689 = vmatmul.mubr.f32.gmra.mxu1 %v232_v29 }
  0x71   : > { %1691 = vmatprep.mubr.f32.mxu1 %v233_v30 }
  0x72   : > { %1680 = vmatmul.mubr.f32.gmra.mxu0 %v226_v31 }
  0x74   : > { %1692 = vmatmul.mubr.f32.gmra.mxu1 %v234_v32 }
 0x126   : > { %v1672_v33 = vpop.f32.mrf.mxu0 }
 0x127   : > { %v422_v39 = vmul.f32 %v1672_v33, %v1672_v33 }
 0x128   : > { %v317_v34 = vpop.f32.mrf.mxu0  ;;  %v1684_v35 = vpop.f32.mrf.mxu1 }
 0x129   : > { %v421_v36 = vmul.f32 %v317_v34, %v317_v34  ;;  %v397_v40 = vadd.f32 %v1672_v33, %v317_v34  ;;  %v430_v7 = vmul.f32 %v1684_v35, %v1684_v35 }
 0x12a   : > { %v1675_v37 = vpop.f32.mrf.mxu0  ;;  %v357_v38 = vpop.f32.mrf.mxu1 }
 0x12b   : > { %v437_v42 = vadd.f32 %v422_v39, %v421_v36  ;;  %v424_v47 = vmul.f32 %v1675_v37, %v1675_v37  ;;  %v429_v5 = vmul.f32 %v357_v38, %v357_v38 }
 0x12c   : > { %v327_v41 = vpop.f32.mrf.mxu0  ;;  %v1687_v46 = vpop.f32.mrf.mxu1 }
 0x12d   : > { %v398_v43 = vadd.f32 %v397_v40, %v327_v41  ;;  %v423_v44 = vmul.f32 %v327_v41, %v327_v41  ;;  %v432_v14 = vmul.f32 %v1687_v46, %v1687_v46  ;;  %v396_v40 = vld [vmem:[#allocation2] sm:$0x1] }
 0x12e   : > { %v1678_v45 = vpop.f32.mrf.mxu0  ;;  %v367_v55 = vpop.f32.mrf.mxu1 }
 0x12f   : > { %v438_v48 = vadd.f32 %v437_v42, %v423_v44  ;;  %v399_v49 = vadd.f32 %v1675_v37, %v398_v43  ;;  %v426_v56 = vmul.f32 %v1678_v45, %v1678_v45  ;;  %v431_v11 = vmul.f32 %v367_v55, %v367_v55  ;;  %v420_v43 = vld [vmem:[#allocation2 + $0x1] sm:$0x1] }
 0x130   : > { %v337_v50 = vpop.f32.mrf.mxu0  ;;  %v1690_v63 = vpop.f32.mrf.mxu1 }
 0x131   : > { %v400_v51 = vadd.f32 %v399_v49, %v337_v50  ;;  %v425_v52 = vmul.f32 %v337_v50, %v337_v50  ;;  %v439_v53 = vadd.f32 %v438_v48, %v424_v47  ;;  %v434_v21 = vmul.f32 %v1690_v63, %v1690_v63 }
 0x132   : > { %v1681_v54 = vpop.f32.mrf.mxu0  ;;  %v377_v6 = vpop.f32.mrf.mxu1 }
 0x133   : > { %v440_v57 = vadd.f32 %v439_v53, %v425_v52  ;;  %v401_v58 = vadd.f32 %v1678_v45, %v400_v51  ;;  %v428_v0 = vmul.f32 %v1681_v54, %v1681_v54  ;;  %v433_v18 = vmul.f32 %v377_v6, %v377_v6 }
 0x134   : > { %v347_v59 = vpop.f32.mrf.mxu0  ;;  %v1693_v13 = vpop.f32.mrf.mxu1 }
 0x135   : > { %v402_v60 = vadd.f32 %v401_v58, %v347_v59  ;;  %v427_v61 = vmul.f32 %v347_v59, %v347_v59  ;;  %v441_v62 = vadd.f32 %v440_v57, %v426_v56  ;;  %v436_v27 = vmul.f32 %v1693_v13, %v1693_v13 }
 0x136   : > { %v387_v20 = vpop.f32.mrf.mxu1 }
 0x137   : > { %v403_v1 = vadd.f32 %v1681_v54, %v402_v60  ;;  %v442_v2 = vadd.f32 %v441_v62, %v427_v61  ;;  %v435_v25 = vmul.f32 %v387_v20, %v387_v20 }
 0x139   : > { %v443_v3 = vadd.f32 %v442_v2, %v428_v0  ;;  %v404_v4 = vadd.f32 %v403_v1, %v357_v38 }
 0x13b   : > { %v444_v8 = vadd.f32 %v443_v3, %v429_v5  ;;  %v405_v9 = vadd.f32 %v1684_v35, %v404_v4 }
 0x13d   : > { %v406_v10 = vadd.f32 %v405_v9, %v367_v55  ;;  %v445_v12 = vadd.f32 %v444_v8, %v430_v7 }
 0x13f   : > { %v446_v15 = vadd.f32 %v445_v12, %v431_v11  ;;  %v407_v16 = vadd.f32 %v1687_v46, %v406_v10 }
 0x141   : > { %v408_v17 = vadd.f32 %v407_v16, %v377_v6  ;;  %v447_v19 = vadd.f32 %v446_v15, %v432_v14 }
 0x143   : > { %v448_v22 = vadd.f32 %v447_v19, %v433_v18  ;;  %v409_v23 = vadd.f32 %v1690_v63, %v408_v17 }
 0x145   : > { %v410_v24 = vadd.f32 %v409_v23, %v387_v20  ;;  %v449_v26 = vadd.f32 %v448_v22, %v434_v21 }
 0x147   : > { %v411_v28 = vadd.f32 %v1693_v13, %v410_v24  ;;  %v450_v29 = vadd.f32 %v449_v26, %v435_v25 }
 0x149   : > { %v412_v30 = vrot.slane %v411_v28, 4  ;;  %v451_v31 = vadd.f32 %v450_v29, %v436_v27 }
 0x14b   : > { %v413_v32 = vadd.f32 %v412_v30, %v411_v28  ;;  %v452_v33 = vrot.slane %v451_v31, 4 }
 0x14d   : > { %v414_v34 = vrot.slane %v413_v32, 2  ;;  %v453_v35 = vadd.f32 %v452_v33, %v451_v31 }
 0x14f   : > { %v415_v36 = vadd.f32 %v414_v34, %v413_v32  ;;  %v454_v37 = vrot.slane %v453_v35, 2 }
 0x151   : > { %v416_v38 = vrot.slane %v415_v36, 1  ;;  %v455_v39 = vadd.f32 %v454_v37, %v453_v35 }
 0x153   : > { %v417_v41 = vadd.f32 %v416_v38, %v415_v36  ;;  %v456_v42 = vrot.slane %v455_v39, 1 }
 0x155   : > { %v418_v44 = vadd.f32 %v417_v41, %v396_v40  ;;  %v457_v45 = vadd.f32 %v456_v42, %v455_v39 }
 0x157   : > { %419 = vst [vmem:[#allocation2] sm:$0x1] %v418_v44  ;;  %v458_v46 = vadd.f32 %v457_v45, %v420_v43 }
 0x159   : > { %459 = vst [vmem:[#allocation2 + $0x1] sm:$0x1] %v458_v46 }
 0x15a PF: > { %p1495_p3 = scmp.ne.s32.totalorder %s2183_s16, 4 }
 0x15c   : > { %463 = sbr.rel (%p1495_p3) target bundleno = 385 (0x181), region = 60 }
 0x161   : > { %v464_v47 = vld [vmem:[#allocation2] sm:$0x1]  ;;  %v466_v48 = vld [vmem:[#allocation2 + $0x1] sm:$0x1] }
 0x162   : > { %v465_v49 = vmul.f32 0.001953125, %v464_v47  ;;  %v467_v50 = vmul.f32 0.001953125, %v466_v48  ;;  %v471_v55 = vld [vmem:[%s2649_s3] sm:$0x1]  ;;  %v476_v58 = vld [vmem:[%s2649_s3 + $0x1] sm:$0x1] }
 0x164   : > { %v468_v51 = vmul.f32 %v465_v49, %v465_v49 }
 0x166   : > { %v469_v52 = vsub.f32 %v467_v50, %v468_v51 }
 0x168   : > { %v470_v53 = vmax.f32 %v469_v52, 0.0 }
 0x16a   : > { %v472_v54 = vadd.f32 1e-05, %v470_v53 }
 0x16c   : > { %1889 = vrsqrt.f32 %v472_v54 }
 0x179   : > { %v1890_v56 = vpop.eup %1889 }
 0x17a   : > { %v474_v57 = vmul.f32 %v1890_v56, %v471_v55 }
 0x17c   : > { %475 = vst [vmem:[#allocation2 + $0x2] sm:$0x1] %v474_v57  ;;  %v477_v59 = vmul.f32 %v474_v57, %v465_v49 }
 0x17e   : > { %v478_v60 = vsub.f32 %v476_v58, %v477_v59 }
 0x180   : > { %479 = vst [vmem:[#allocation2 + $0x3] sm:$0x1] %v478_v60 }
 0x181 PF: > { %p481_p6 = scmp.lt.s32.totalorder %s2183_s16, 8 }
 0x183   : > { %p482_p9 = pnand %p1493_p4, %p481_p6 }
 0x184   : > { %s1496_s18 = sadd.s32 (!%p482_p9), 4294967292, %s2183_s16 }
 0x185   : > { %485 = sbr.rel (%p482_p9) target bundleno = 907 (0x38b), region = 64  ;;  %s2281_s19 = sshll.u32 (!%p482_p9), %s1496_s18, 7 }
 0x186   : > { %s2284_s20 = scalar_lea.vmem (!%p482_p9), [#allocation3], %s2281_s19  ;;  %s2418_s21 = scalar_lea.vmem (!%p482_p9), [#allocation9], %s2281_s19 }
 0x18a   : > { %v520_v61 = vld [vmem:[#allocation6 + $0x78] sm:$0xff]  ;;  %v519_v62 = vld [vmem:[#allocation6 + $0x70] sm:$0xff]  ;;  %v518_v63 = vld [vmem:[#allocation6 + $0x68] sm:$0xff] }
 0x18b   : > { %1694 = vmatprep.subr.mxu0 %v520_v61  ;;  %v517_v0 = vld [vmem:[#allocation6 + $0x60] sm:$0xff]  ;;  %v489_v1 = vld [vmem:[%s2284_s20] sm:$0xff]  ;;  %v515_v3 = vld [vmem:[#allocation6 + $0x50] sm:$0xff] }
 0x18c   : > { %1695 = vmatpush3.msra.mxu0 %v520_v61  ;;  %v516_v2 = vld [vmem:[#allocation6 + $0x58] sm:$0xff]  ;;  %1726 = vmatprep.mubr.f32.mxu0 %v489_v1  ;;  %v514_v4 = vld [vmem:[#allocation6 + $0x48] sm:$0xff]  ;;  %v513_v5 = vld [vmem:[#allocation6 + $0x40] sm:$0xff] }
 0x18d   : > { %1696 = vmatprep.subr.mxu0 %v519_v62  ;;  %v512_v6 = vld [vmem:[#allocation6 + $0x38] sm:$0xff]  ;;  %v511_v7 = vld [vmem:[#allocation6 + $0x30] sm:$0xff]  ;;  %v510_v8 = vld [vmem:[#allocation6 + $0x28] sm:$0xff] }
 0x18e   : > { %1697 = vmatpush3.msra.mxu0 %v519_v62  ;;  %v509_v9 = vld [vmem:[#allocation6 + $0x20] sm:$0xff]  ;;  %v508_v10 = vld [vmem:[#allocation6 + $0x18] sm:$0xff]  ;;  %v507_v11 = vld [vmem:[#allocation6 + $0x10] sm:$0xff] }
 0x18f   : > { %1698 = vmatprep.subr.mxu0 %v518_v63  ;;  %v506_v12 = vld [vmem:[#allocation6 + $0x8] sm:$0xff]  ;;  %v505_v13 = vld [vmem:[#allocation6] sm:$0xff]  ;;  %v492_v16 = vld [vmem:[%s2284_s20 + $0x18] sm:$0xff] }
 0x190   : > { %1699 = vmatpush3.msra.mxu0 %v518_v63  ;;  %v490_v14 = vld [vmem:[%s2284_s20 + $0x8] sm:$0xff]  ;;  %v491_v15 = vld [vmem:[%s2284_s20 + $0x10] sm:$0xff]  ;;  %v493_v17 = vld [vmem:[%s2284_s20 + $0x20] sm:$0xff] }
 0x191   : > { %1700 = vmatprep.subr.mxu0 %v517_v0  ;;  %v494_v18 = vld [vmem:[%s2284_s20 + $0x28] sm:$0xff]  ;;  %v495_v19 = vld [vmem:[%s2284_s20 + $0x30] sm:$0xff]  ;;  %v496_v20 = vld [vmem:[%s2284_s20 + $0x38] sm:$0xff] }
 0x192   : > { %1701 = vmatpush3.msra.mxu0 %v517_v0  ;;  %v497_v21 = vld [vmem:[%s2284_s20 + $0x40] sm:$0xff]  ;;  %v498_v22 = vld [vmem:[%s2284_s20 + $0x48] sm:$0xff]  ;;  %v499_v23 = vld [vmem:[%s2284_s20 + $0x50] sm:$0xff] }
 0x193   : > { %1702 = vmatprep.subr.mxu0 %v516_v2  ;;  %v500_v24 = vld [vmem:[%s2284_s20 + $0x58] sm:$0xff]  ;;  %v501_v25 = vld [vmem:[%s2284_s20 + $0x60] sm:$0xff]  ;;  %v502_v26 = vld [vmem:[%s2284_s20 + $0x68] sm:$0xff] }
 0x194   : > { %1703 = vmatpush3.msra.mxu0 %v516_v2  ;;  %v503_v27 = vld [vmem:[%s2284_s20 + $0x70] sm:$0xff]  ;;  %v504_v28 = vld [vmem:[%s2284_s20 + $0x78] sm:$0xff]  ;;  %v835_v29 = vld [vmem:[#allocation8 + $0x78] sm:$0xff] }
 0x195   : > { %1704 = vmatprep.subr.mxu0 %v515_v3  ;;  %1750 = vmatprep.subr.mxu1 %v835_v29  ;;  %v834_v30 = vld [vmem:[#allocation8 + $0x70] sm:$0xff]  ;;  %v833_v31 = vld [vmem:[#allocation8 + $0x68] sm:$0xff]  ;;  %v832_v32 = vld [vmem:[#allocation8 + $0x60] sm:$0xff] }
 0x196   : > { %1705 = vmatpush3.msra.mxu0 %v515_v3  ;;  %1751 = vmatpush3.msra.mxu1 %v835_v29  ;;  %v831_v33 = vld [vmem:[#allocation8 + $0x58] sm:$0xff]  ;;  %v830_v34 = vld [vmem:[#allocation8 + $0x50] sm:$0xff]  ;;  %v829_v35 = vld [vmem:[#allocation8 + $0x48] sm:$0xff] }
 0x197   : > { %1706 = vmatprep.subr.mxu0 %v514_v4  ;;  %1752 = vmatprep.subr.mxu1 %v834_v30  ;;  %v828_v36 = vld [vmem:[#allocation8 + $0x40] sm:$0xff]  ;;  %v827_v37 = vld [vmem:[#allocation8 + $0x38] sm:$0xff]  ;;  %v826_v38 = vld [vmem:[#allocation8 + $0x30] sm:$0xff] }
 0x198   : > { %1707 = vmatpush3.msra.mxu0 %v514_v4  ;;  %1753 = vmatpush3.msra.mxu1 %v834_v30  ;;  %v825_v39 = vld [vmem:[#allocation8 + $0x28] sm:$0xff]  ;;  %v824_v40 = vld [vmem:[#allocation8 + $0x20] sm:$0xff]  ;;  %v823_v41 = vld [vmem:[#allocation8 + $0x18] sm:$0xff] }
 0x199   : > { %1708 = vmatprep.subr.mxu0 %v513_v5  ;;  %1754 = vmatprep.subr.mxu1 %v833_v31  ;;  %v822_v42 = vld [vmem:[#allocation8 + $0x10] sm:$0xff]  ;;  %v821_v43 = vld [vmem:[#allocation8 + $0x8] sm:$0xff]  ;;  %v820_v44 = vld [vmem:[#allocation8] sm:$0xff] }
 0x19a   : > { %1709 = vmatpush3.msra.mxu0 %v513_v5  ;;  %1755 = vmatpush3.msra.mxu1 %v833_v31  ;;  %v2302_v45 = vld [vmem:[#allocation2 + $0x2] ss:$0 sm:$0xff]  ;;  %v2304_v47 = vld [vmem:[#allocation2 + $0x3] ss:$0 sm:$0xff] }
 0x19b   : > { %1710 = vmatprep.subr.mxu0 %v512_v6  ;;  %1756 = vmatprep.subr.mxu1 %v832_v32 }
 0x19c   : > { %1711 = vmatpush3.msra.mxu0 %v512_v6  ;;  %1757 = vmatpush3.msra.mxu1 %v832_v32 }
 0x19d   : > { %1712 = vmatprep.subr.mxu0 %v511_v7  ;;  %1758 = vmatprep.subr.mxu1 %v831_v33 }
 0x19e   : > { %1713 = vmatpush3.msra.mxu0 %v511_v7  ;;  %1759 = vmatpush3.msra.mxu1 %v831_v33 }
 0x19f   : > { %1714 = vmatprep.subr.mxu0 %v510_v8  ;;  %1760 = vmatprep.subr.mxu1 %v830_v34 }
 0x1a0   : > { %1715 = vmatpush3.msra.mxu0 %v510_v8  ;;  %1761 = vmatpush3.msra.mxu1 %v830_v34 }
 0x1a1   : > { %1716 = vmatprep.subr.mxu0 %v509_v9  ;;  %1762 = vmatprep.subr.mxu1 %v829_v35 }
 0x1a2   : > { %1717 = vmatpush3.msra.mxu0 %v509_v9  ;;  %1763 = vmatpush3.msra.mxu1 %v829_v35 }
 0x1a3   : > { %1718 = vmatprep.subr.mxu0 %v508_v10  ;;  %1764 = vmatprep.subr.mxu1 %v828_v36 }
 0x1a4   : > { %1719 = vmatpush3.msra.mxu0 %v508_v10  ;;  %1765 = vmatpush3.msra.mxu1 %v828_v36 }
 0x1a5   : > { %1720 = vmatprep.subr.mxu0 %v507_v11  ;;  %1766 = vmatprep.subr.mxu1 %v827_v37 }
 0x1a6   : > { %1721 = vmatpush3.msra.mxu0 %v507_v11  ;;  %1767 = vmatpush3.msra.mxu1 %v827_v37 }
 0x1a7   : > { %1722 = vmatprep.subr.mxu0 %v506_v12  ;;  %1768 = vmatprep.subr.mxu1 %v826_v38 }
 0x1a8   : > { %1723 = vmatpush3.msra.mxu0 %v506_v12  ;;  %1769 = vmatpush3.msra.mxu1 %v826_v38 }
 0x1a9   : > { %1724 = vmatprep.subr.mxu0 %v505_v13  ;;  %1770 = vmatprep.subr.mxu1 %v825_v39 }
 0x1aa   : > { %1725 = vmatpush3.msra.mxu0 %v505_v13  ;;  %1771 = vmatpush3.msra.mxu1 %v825_v39 }
 0x1ab   : > { %1727 = vmatmul.mubr.f32.vlgmr.msra.gmra.mxu0 %v490_v14  ;;  %1772 = vmatprep.subr.mxu1 %v824_v40 }
 0x1ac   : > { %1729 = vmatprep.mubr.f32.mxu0 %v491_v15  ;;  %1773 = vmatpush3.msra.mxu1 %v824_v40 }
 0x1ad   : > { %1774 = vmatprep.subr.mxu1 %v823_v41 }
 0x1ae   : > { %1775 = vmatpush3.msra.mxu1 %v823_v41 }
 0x1af   : > { %1730 = vmatmul.mubr.f32.gmra.mxu0 %v492_v16  ;;  %1776 = vmatprep.subr.mxu1 %v822_v42 }
 0x1b0   : > { %1732 = vmatprep.mubr.f32.mxu0 %v493_v17  ;;  %1777 = vmatpush3.msra.mxu1 %v822_v42 }
 0x1b1   : > { %1778 = vmatprep.subr.mxu1 %v821_v43 }
 0x1b2   : > { %1779 = vmatpush3.msra.mxu1 %v821_v43 }
 0x1b3   : > { %1733 = vmatmul.mubr.f32.gmra.mxu0 %v494_v18  ;;  %1780 = vmatprep.subr.mxu1 %v820_v44 }
 0x1b4   : > { %1735 = vmatprep.mubr.f32.mxu0 %v495_v19  ;;  %1781 = vmatpush3.msra.mxu1 %v820_v44 }
 0x1b7   : > { %1736 = vmatmul.mubr.f32.gmra.mxu0 %v496_v20 }
 0x1b8   : > { %1738 = vmatprep.mubr.f32.mxu0 %v497_v21 }
 0x1bb   : > { %1739 = vmatmul.mubr.f32.gmra.mxu0 %v498_v22 }
 0x1bc   : > { %1741 = vmatprep.mubr.f32.mxu0 %v499_v23 }
 0x1bf   : > { %1742 = vmatmul.mubr.f32.gmra.mxu0 %v500_v24 }
 0x1c0   : > { %1744 = vmatprep.mubr.f32.mxu0 %v501_v25 }
 0x1c3   : > { %1745 = vmatmul.mubr.f32.gmra.mxu0 %v502_v26 }
 0x1c4   : > { %1747 = vmatprep.mubr.f32.mxu0 %v503_v27 }
 0x1c7   : > { %1748 = vmatmul.mubr.f32.gmra.mxu0 %v504_v28 }
 0x26b   : > { %v1728_v46 = vpop.f32.mrf.mxu0 }
 0x26c   : > { %v672_v48 = vmul.f32 %v1728_v46, %v2302_v45 }
 0x26d   : > { %v587_v49 = vpop.f32.mrf.mxu0 }
 0x26e   : > { %v2308_v50 = vadd.f32 %v2304_v47, %v672_v48  ;;  %v671_v51 = vmul.f32 %v2302_v45, %v587_v49 }
 0x26f   : > { %v1731_v52 = vpop.f32.mrf.mxu0 }
 0x270   : > { %v1501_v53 = vmul.f32 -1.442695, %v2308_v50  ;;  %v674_v54 = vmul.f32 %v1731_v52, %v2302_v45  ;;  %v2314_v55 = vadd.f32 %v2304_v47, %v671_v51 }
 0x271   : > { %v597_v56 = vpop.f32.mrf.mxu0 }
 0x272   : > { %1891 = vpow2.f32 %v1501_v53  ;;  %v2317_v57 = vadd.f32 %v2304_v47, %v674_v54  ;;  %v673_v58 = vmul.f32 %v2302_v45, %v597_v56  ;;  %v1500_v59 = vmul.f32 -1.442695, %v2314_v55 }
 0x273   : > { %v1734_v60 = vpop.f32.mrf.mxu0 }
 0x274   : > { %v1503_v61 = vmul.f32 -1.442695, %v2317_v57  ;;  %v2323_v62 = vadd.f32 %v2304_v47, %v673_v58  ;;  %v676_v63 = vmul.f32 %v1734_v60, %v2302_v45  ;;  %1893 = vpow2.f32 %v1500_v59 }
 0x275   : > { %v607_v0 = vpop.f32.mrf.mxu0 }
 0x276   : > { %1895 = vpow2.f32 %v1503_v61  ;;  %v1502_v1 = vmul.f32 -1.442695, %v2323_v62  ;;  %v2328_v2 = vadd.f32 %v2304_v47, %v676_v63  ;;  %v675_v3 = vmul.f32 %v2302_v45, %v607_v0 }
 0x277   : > { %v1737_v4 = vpop.f32.mrf.mxu0 }
 0x278   : > { %1897 = vpow2.f32 %v1502_v1  ;;  %v1505_v5 = vmul.f32 -1.442695, %v2328_v2  ;;  %v2333_v6 = vadd.f32 %v2304_v47, %v675_v3  ;;  %v678_v7 = vmul.f32 %v1737_v4, %v2302_v45 }
 0x279   : > { %v617_v8 = vpop.f32.mrf.mxu0 }
 0x27a   : > { %1899 = vpow2.f32 %v1505_v5  ;;  %v1504_v9 = vmul.f32 -1.442695, %v2333_v6  ;;  %v2338_v10 = vadd.f32 %v2304_v47, %v678_v7  ;;  %v677_v11 = vmul.f32 %v2302_v45, %v617_v8 }
 0x27b   : > { %v1740_v12 = vpop.f32.mrf.mxu0 }
 0x27c   : > { %1901 = vpow2.f32 %v1504_v9  ;;  %v1507_v13 = vmul.f32 -1.442695, %v2338_v10  ;;  %v2343_v14 = vadd.f32 %v2304_v47, %v677_v11  ;;  %v680_v15 = vmul.f32 %v1740_v12, %v2302_v45 }
 0x27d   : > { %v627_v16 = vpop.f32.mrf.mxu0 }
 0x27e   : > { %1903 = vpow2.f32 %v1507_v13  ;;  %v1506_v17 = vmul.f32 -1.442695, %v2343_v14  ;;  %v2348_v18 = vadd.f32 %v2304_v47, %v680_v15  ;;  %v679_v19 = vmul.f32 %v2302_v45, %v627_v16 }
 0x27f   : > { %v1892_v20 = vpop.eup %1891  ;;  %v1743_v21 = vpop.f32.mrf.mxu0 }
 0x280   : > { %v757_v22 = vadd.f32 1.0, %v1892_v20  ;;  %1905 = vpow2.f32 %v1506_v17  ;;  %v1509_v23 = vmul.f32 -1.442695, %v2348_v18  ;;  %v2353_v24 = vadd.f32 %v2304_v47, %v679_v19 }
 0x281   : > { %v1894_v25 = vpop.eup %1893  ;;  %v682_v26 = vmul.f32 %v1743_v21, %v2302_v45  ;;  %v637_v27 = vpop.f32.mrf.mxu0 }
 0x282   : > { %1907 = vrcp.f32 %v757_v22  ;;  %v1508_v28 = vmul.f32 -1.442695, %v2353_v24  ;;  %v681_v29 = vmul.f32 %v2302_v45, %v637_v27  ;;  %v756_v30 = vadd.f32 1.0, %v1894_v25 }
 0x283   : > { %v1896_v31 = vpop.eup %1895  ;;  %1909 = vpow2.f32 %v1509_v23  ;;  %v2359_v32 = vadd.f32 %v2304_v47, %v682_v26  ;;  %v1746_v33 = vpop.f32.mrf.mxu0 }
 0x284   : > { %v759_v34 = vadd.f32 1.0, %v1896_v31  ;;  %1911 = vpow2.f32 %v1508_v28  ;;  %v2362_v35 = vadd.f32 %v2304_v47, %v681_v29  ;;  %v684_v36 = vmul.f32 %v1746_v33, %v2302_v45 }
 0x285   : > { %v1898_v37 = vpop.eup %1897  ;;  %v1511_v38 = vmul.f32 -1.442695, %v2359_v32  ;;  %v647_v39 = vpop.f32.mrf.mxu0  ;;  %1913 = vrcp.f32 %v756_v30 }
 0x286   : > { %1915 = vrcp.f32 %v759_v34  ;;  %v758_v40 = vadd.f32 1.0, %v1898_v37  ;;  %v1510_v41 = vmul.f32 -1.442695, %v2362_v35  ;;  %v2368_v42 = vadd.f32 %v2304_v47, %v684_v36 }
 0x287   : > { %v1900_v43 = vpop.eup %1899  ;;  %1917 = vpow2.f32 %v1511_v38  ;;  %v683_v44 = vmul.f32 %v2302_v45, %v647_v39  ;;  %v1749_v46 = vpop.f32.mrf.mxu0 }
 0x288   : > { %1919 = vrcp.f32 %v758_v40  ;;  %v761_v48 = vadd.f32 1.0, %v1900_v43  ;;  %v1513_v49 = vmul.f32 -1.442695, %v2368_v42  ;;  %v686_v51 = vmul.f32 %v1749_v46, %v2302_v45 }
 0x289   : > { %v1902_v52 = vpop.eup %1901  ;;  %1921 = vpow2.f32 %v1510_v41  ;;  %v2374_v53 = vadd.f32 %v2304_v47, %v683_v44  ;;  %v657_v54 = vpop.f32.mrf.mxu0 }
 0x28a   : > { %1923 = vrcp.f32 %v761_v48  ;;  %v760_v56 = vadd.f32 1.0, %v1902_v52  ;;  %v2377_v58 = vadd.f32 %v2304_v47, %v686_v51  ;;  %v685_v59 = vmul.f32 %v2302_v45, %v657_v54 }
 0x28b   : > { %v1904_v60 = vpop.eup %1903  ;;  %1925 = vpow2.f32 %v1513_v49  ;;  %v1512_v61 = vmul.f32 -1.442695, %v2374_v53 }
 0x28c   : > { %1927 = vrcp.f32 %v760_v56  ;;  %v763_v63 = vadd.f32 1.0, %v1904_v60  ;;  %v1515_v0 = vmul.f32 -1.442695, %v2377_v58  ;;  %v2383_v1 = vadd.f32 %v2304_v47, %v685_v59 }
 0x28d   : > { %v1906_v3 = vpop.eup %1905  ;;  %1929 = vpow2.f32 %v1512_v61  ;;  %v2406_v56 = vstv %s2281_s19 }
 0x28e   : > { %1931 = vrcp.f32 %v763_v63  ;;  %v762_v4 = vadd.f32 1.0, %v1906_v3  ;;  %v1514_v5 = vmul.f32 -1.442695, %v2383_v1 }
 0x28f   : > { %v1908_v7 = vpop.eup %1907  ;;  %1933 = vpow2.f32 %v1515_v0 }
 0x290   : > { %v1910_v45 = vpop.eup %1909  ;;  %1935 = vrcp.f32 %v762_v4  ;;  %v805_v16 = vmul.f32 %v1908_v7, %v2308_v50 }
 0x291   : > { %v1912_v8 = vpop.eup %1911  ;;  %v765_v9 = vadd.f32 1.0, %v1910_v45  ;;  %1937 = vpow2.f32 %v1514_v5 }
 0x292   : > { %v1914_v11 = vpop.eup %1913  ;;  %v764_v12 = vadd.f32 1.0, %v1912_v8 }
 0x293   : > { %v1916_v13 = vpop.eup %1915  ;;  %1939 = vrcp.f32 %v765_v9  ;;  %v804_v47 = vmul.f32 %v1914_v11, %v2314_v55 }
 0x294   : > { %v1918_v15 = vpop.eup %1917  ;;  %1941 = vrcp.f32 %v764_v12  ;;  %v807_v26 = vmul.f32 %v1916_v13, %v2317_v57 }
 0x295   : > { %v1920_v17 = vpop.eup %1919  ;;  %v767_v19 = vadd.f32 1.0, %v1918_v15  ;;  %1782 = vmatprep.mubr.f32.mxu1 %v804_v47 }
 0x296   : > { %v1922_v20 = vpop.eup %1921  ;;  %1783 = vmatmul.mubr.f32.vlgmr.msra.gmra.mxu1 %v805_v16  ;;  %v806_v21 = vmul.f32 %v1920_v17, %v2323_v62 }
 0x297   : > { %v1924_v22 = vpop.eup %1923  ;;  %v766_v23 = vadd.f32 1.0, %v1922_v20  ;;  %1943 = vrcp.f32 %v767_v19 }
 0x298   : > { %v1926_v25 = vpop.eup %1925  ;;  %1785 = vmatprep.mubr.f32.mxu1 %v806_v21  ;;  %v809_v62 = vmul.f32 %v1924_v22, %v2328_v2 }
 0x299   : > { %v1928_v27 = vpop.eup %1927  ;;  %1945 = vrcp.f32 %v766_v23  ;;  %v769_v55 = vadd.f32 1.0, %v1926_v25 }
 0x29a   : > { %v1930_v28 = vpop.eup %1929  ;;  %1786 = vmatmul.mubr.f32.gmra.mxu1 %v807_v26  ;;  %v808_v50 = vmul.f32 %v1928_v27, %v2333_v6 }
 0x29b   : > { %v1932_v29 = vpop.eup %1931  ;;  %v768_v30 = vadd.f32 1.0, %v1930_v28  ;;  %1947 = vrcp.f32 %v769_v55 }
 0x29c   : > { %v1934_v31 = vpop.eup %1933  ;;  %1788 = vmatprep.mubr.f32.mxu1 %v808_v50  ;;  %v811_v6 = vmul.f32 %v1932_v29, %v2338_v10 }
 0x29d   : > { %v1936_v33 = vpop.eup %1935  ;;  %1949 = vrcp.f32 %v768_v30  ;;  %v771_v34 = vadd.f32 1.0, %v1934_v31 }
 0x29e   : > { %v1938_v36 = vpop.eup %1937  ;;  %1789 = vmatmul.mubr.f32.gmra.mxu1 %v809_v62  ;;  %v810_v57 = vmul.f32 %v1936_v33, %v2343_v14 }
 0x29f   : > { %v770_v37 = vadd.f32 1.0, %v1938_v36  ;;  %1951 = vrcp.f32 %v771_v34 }
 0x2a0   : > { %v1940_v38 = vpop.eup %1939  ;;  %1791 = vmatprep.mubr.f32.mxu1 %v810_v57 }
 0x2a1   : > { %v1942_v39 = vpop.eup %1941  ;;  %1953 = vrcp.f32 %v770_v37  ;;  %v813_v2 = vmul.f32 %v1940_v38, %v2348_v18 }
 0x2a2   : > { %1792 = vmatmul.mubr.f32.gmra.mxu1 %v811_v6  ;;  %v812_v40 = vmul.f32 %v1942_v39, %v2353_v24 }
 0x2a4   : > { %1794 = vmatprep.mubr.f32.mxu1 %v812_v40  ;;  %v1944_v41 = vpop.eup %1943 }
 0x2a5   : > { %v815_v14 = vmul.f32 %v1944_v41, %v2359_v32  ;;  %v998_v32 = vlaneseq }
 0x2a6   : > { %v1946_v43 = vpop.eup %1945  ;;  %1795 = vmatmul.mubr.f32.gmra.mxu1 %v813_v2 }
 0x2a7   : > { %v814_v44 = vmul.f32 %v1946_v43, %v2362_v35  ;;  %v2402_v35 = vshrl.u32 %v998_v32, 7 }
 0x2a8   : > { %v1948_v46 = vpop.eup %1947 }
 0x2a9   : > { %1797 = vmatprep.mubr.f32.mxu1 %v814_v44  ;;  %v817_v49 = vmul.f32 %v1948_v46, %v2368_v42  ;;  %v1000_v54 = vadd.s32 8, %v2402_v35  ;;  %v1002_v59 = vadd.s32 24, %v2402_v35  ;;  %v1001_v60 = vadd.s32 16, %v2402_v35 }
 0x2aa   : > { %v1950_v48 = vpop.eup %1949  ;;  %1798 = vmatmul.mubr.f32.gmra.mxu1 %v815_v14  ;;  %v1003_v61 = vadd.s32 32, %v2402_v35  ;;  %v1006_v7 = vadd.s32 56, %v2402_v35  ;;  %v1005_v9 = vadd.s32 48, %v2402_v35  ;;  %v1008_v21 = vadd.s32 72, %v2402_v35 }
 0x2ab   : > { %v816_v10 = vmul.f32 %v1950_v48, %v2374_v53  ;;  %v1017_v42 = vadd.s32 %v2406_v56, %v1000_v54  ;;  %v1016_v53 = vadd.s32 %v2406_v56, %v2402_v35  ;;  %v1019_v0 = vadd.s32 %v2406_v56, %v1002_v59 }
 0x2ac   : > { %v1952_v24 = vpop.eup %1951  ;;  %v1020_v5 = vadd.s32 %v2406_v56, %v1003_v61  ;;  %v1023_v16 = vadd.s32 %v2406_v56, %v1006_v7  ;;  %v1022_v20 = vadd.s32 %v2406_v56, %v1005_v9  ;;  %v1007_v27 = vadd.s32 64, %v2402_v35 }
 0x2ad   : > { %1800 = vmatprep.mubr.f32.mxu1 %v816_v10  ;;  %v819_v52 = vmul.f32 %v1952_v24, %v2377_v58  ;;  %v1004_v58 = vadd.s32 40, %v2402_v35  ;;  %vm1033_vm0 = vcmp.lt.s32.totalorder %v1017_v42, 512  ;;  %vm1032_vm1 = vcmp.lt.s32.totalorder %v1016_v53, 512 }
 0x2ae   : > { %v1954_v51 = vpop.eup %1953  ;;  %1801 = vmatmul.mubr.f32.gmra.mxu1 %v817_v49  ;;  %vm1035_vm2 = vcmp.lt.s32.totalorder %v1019_v0, 512  ;;  %vm1036_vm5 = vcmp.lt.s32.totalorder %v1020_v5, 512  ;;  %v1010_v55 = vadd.s32 88, %v2402_v35  ;;  %v1009_v28 = vadd.s32 80, %v2402_v35 }
 0x2af   : > { %v818_v18 = vmul.f32 %v1954_v51, %v2383_v1  ;;  %v1018_v1 = vadd.s32 %v2406_v56, %v1001_v60  ;;  %v1021_v3 = vadd.s32 %v2406_v56, %v1004_v58  ;;  %vm1039_vm6 = vcmp.lt.s32.totalorder %v1023_v16, 512 }
 0x2b0   : > { %vm1038_vm7 = vcmp.lt.s32.totalorder %v1022_v20, 512  ;;  %v1025_v34 = vadd.s32 %v2406_v56, %v1008_v21  ;;  %v1024_v6 = vadd.s32 %v2406_v56, %v1007_v27  ;;  %v1027_v39 = vadd.s32 %v2406_v56, %v1010_v55 }
 0x2b1   : > { %1803 = vmatprep.mubr.f32.mxu1 %v818_v18  ;;  %vm1034_vm3 = vcmp.lt.s32.totalorder %v1018_v1, 512  ;;  %vm1037_vm4 = vcmp.lt.s32.totalorder %v1021_v3, 512  ;;  %v1026_v40 = vadd.s32 %v2406_v56, %v1009_v28  ;;  %v1012_v14 = vadd.s32 104, %v2402_v35 }
 0x2b2   : > { %1804 = vmatmul.mubr.f32.gmra.mxu1 %v819_v52  ;;  %vm1041_vm8 = vcmp.lt.s32.totalorder %v1025_v34, 512  ;;  %v1011_v10 = vadd.s32 96, %v2402_v35  ;;  %vm1040_vm9 = vcmp.lt.s32.totalorder %v1024_v6, 512  ;;  %vm1043_vm10 = vcmp.lt.s32.totalorder %v1027_v39, 512 }
 0x2b3   : > { %vm1042_vm11 = vcmp.lt.s32.totalorder %v1026_v40, 512  ;;  %v1029_v53 = vadd.s32 %v2406_v56, %v1012_v14  ;;  %v1014_v61 = vadd.s32 120, %v2402_v35 }
 0x2b4   : > { %v1028_v58 = vadd.s32 %v2406_v56, %v1011_v10 }
 0x2b5   : > { %vm1045_vm12 = vcmp.lt.s32.totalorder %v1029_v53, 512 }
 0x2b6   : > { %vm1044_vm13 = vcmp.lt.s32.totalorder %v1028_v58, 512 }
 0x356   : > { %v1784_v63 = vpop.f32.mrf.mxu1 }
 0x357   : > { %983 = vst [vmem:[%s2418_s21 + $0x8] sm:$0xff] %v1784_v63  ;;  %v1081_v45 = vsel %vm1033_vm0, %v1784_v63, 0.0 }
 0x358   : > { %v902_v4 = vpop.f32.mrf.mxu1  ;;  %v1122_v13 = vmul.f32 %v1784_v63, %v1081_v45 }
 0x359   : > { %982 = vst [vmem:[%s2418_s21] sm:$0xff] %v902_v4  ;;  %v1080_v8 = vsel %vm1032_vm1, %v902_v4, 0.0 }
 0x35a   : > { %v1121_v11 = vmul.f32 %v1080_v8, %v902_v4  ;;  %v1787_v12 = vpop.f32.mrf.mxu1  ;;  %v1097_v47 = vadd.f32 %v1081_v45, %v1080_v8  ;;  %v1013_v4 = vadd.s32 112, %v2402_v35 }
 0x35b   : > { %985 = vst [vmem:[%s2418_s21 + $0x18] sm:$0xff] %v1787_v12  ;;  %v1083_v17 = vsel %vm1035_vm2, %v1787_v12, 0.0 }
 0x35c   : > { %v912_v15 = vpop.f32.mrf.mxu1  ;;  %v1137_v22 = vadd.f32 %v1122_v13, %v1121_v11  ;;  %v1124_v50 = vmul.f32 %v1787_v12, %v1083_v17  ;;  %v1031_v12 = vadd.s32 %v2406_v56, %v1014_v61  ;;  %v1030_v16 = vadd.s32 %v2406_v56, %v1013_v4 }
 0x35d   : > { %984 = vst [vmem:[%s2418_s21 + $0x10] sm:$0xff] %v912_v15  ;;  %v1082_v19 = vsel %vm1034_vm3, %v912_v15, 0.0 }
 0x35e   : > { %v1098_v23 = vadd.f32 %v1097_v47, %v1082_v19  ;;  %v1123_v25 = vmul.f32 %v1082_v19, %v912_v15  ;;  %v1790_v26 = vpop.f32.mrf.mxu1  ;;  %vm1047_vm14 = vcmp.lt.s32.totalorder %v1031_v12, 512  ;;  %vm1046_vm15 = vcmp.lt.s32.totalorder %v1030_v16, 512 }
 0x35f   : > { %987 = vst [vmem:[%s2418_s21 + $0x28] sm:$0xff] %v1790_v26  ;;  %v1085_v62 = vsel %vm1037_vm4, %v1790_v26, 0.0 }
 0x360   : > { %v1138_v29 = vadd.f32 %v1137_v22, %v1123_v25  ;;  %v922_v30 = vpop.f32.mrf.mxu1  ;;  %v1099_v31 = vadd.f32 %v1098_v23, %v1083_v17  ;;  %v1126_v2 = vmul.f32 %v1790_v26, %v1085_v62 }
 0x361   : > { %986 = vst [vmem:[%s2418_s21 + $0x20] sm:$0xff] %v922_v30  ;;  %v1084_v33 = vsel %vm1036_vm5, %v922_v30, 0.0 }
 0x362   : > { %v1100_v36 = vadd.f32 %v1099_v31, %v1084_v33  ;;  %v1125_v57 = vmul.f32 %v1084_v33, %v922_v30  ;;  %v1139_v37 = vadd.f32 %v1138_v29, %v1124_v50  ;;  %v1793_v38 = vpop.f32.mrf.mxu1 }
 0x363   : > { %989 = vst [vmem:[%s2418_s21 + $0x38] sm:$0xff] %v1793_v38  ;;  %v1087_v46 = vsel %vm1039_vm6, %v1793_v38, 0.0 }
 0x364   : > { %v1140_v41 = vadd.f32 %v1139_v37, %v1125_v57  ;;  %v932_v43 = vpop.f32.mrf.mxu1  ;;  %v1101_v44 = vadd.f32 %v1100_v36, %v1085_v62  ;;  %v1128_v52 = vmul.f32 %v1793_v38, %v1087_v46 }
 0x365   : > { %988 = vst [vmem:[%s2418_s21 + $0x30] sm:$0xff] %v932_v43  ;;  %v1086_v48 = vsel %vm1038_vm7, %v932_v43, 0.0 }
 0x366   : > { %v1102_v49 = vadd.f32 %v1101_v44, %v1086_v48  ;;  %v1127_v24 = vmul.f32 %v1086_v48, %v932_v43  ;;  %v1141_v51 = vadd.f32 %v1140_v41, %v1126_v2  ;;  %v1796_v18 = vpop.f32.mrf.mxu1  ;;  %v1096_v48 = vld [vmem:[#allocation2 + $0x4] sm:$0x1] }
 0x367   : > { %991 = vst [vmem:[%s2418_s21 + $0x48] sm:$0xff] %v1796_v18  ;;  %v1089_v59 = vsel %vm1041_vm8, %v1796_v18, 0.0 }
 0x368   : > { %v1142_v32 = vadd.f32 %v1141_v51, %v1127_v24  ;;  %v942_v54 = vpop.f32.mrf.mxu1  ;;  %v1103_v42 = vadd.f32 %v1102_v49, %v1087_v46  ;;  %v1130_v5 = vmul.f32 %v1796_v18, %v1089_v59  ;;  %v1120_v24 = vld [vmem:[#allocation2 + $0x5] sm:$0x1] }
 0x369   : > { %990 = vst [vmem:[%s2418_s21 + $0x40] sm:$0xff] %v942_v54  ;;  %v1088_v60 = vsel %vm1040_vm9, %v942_v54, 0.0 }
 0x36a   : > { %v1104_v63 = vadd.f32 %v1103_v42, %v1088_v60  ;;  %v1129_v0 = vmul.f32 %v1088_v60, %v942_v54  ;;  %v1143_v1 = vadd.f32 %v1142_v32, %v1128_v52  ;;  %v1799_v3 = vpop.f32.mrf.mxu1 }
 0x36b   : > { %993 = vst [vmem:[%s2418_s21 + $0x58] sm:$0xff] %v1799_v3  ;;  %v1091_v9 = vsel %vm1043_vm10, %v1799_v3, 0.0 }
 0x36c   : > { %v1144_v7 = vadd.f32 %v1143_v1, %v1129_v0  ;;  %v952_v45 = vpop.f32.mrf.mxu1  ;;  %v1105_v8 = vadd.f32 %v1104_v63, %v1089_v59  ;;  %v1132_v17 = vmul.f32 %v1799_v3, %v1091_v9 }
 0x36d   : > { %992 = vst [vmem:[%s2418_s21 + $0x50] sm:$0xff] %v952_v45  ;;  %v1090_v11 = vsel %vm1042_vm11, %v952_v45, 0.0 }
 0x36e   : > { %v1106_v13 = vadd.f32 %v1105_v8, %v1090_v11  ;;  %v1131_v47 = vmul.f32 %v1090_v11, %v952_v45  ;;  %v1145_v15 = vadd.f32 %v1144_v7, %v1130_v5  ;;  %v1802_v35 = vpop.f32.mrf.mxu1 }
 0x36f   : > { %995 = vst [vmem:[%s2418_s21 + $0x68] sm:$0xff] %v1802_v35  ;;  %v1093_v22 = vsel %vm1045_vm12, %v1802_v35, 0.0 }
 0x370   : > { %v1146_v19 = vadd.f32 %v1145_v15, %v1131_v47  ;;  %v962_v20 = vpop.f32.mrf.mxu1  ;;  %v1107_v21 = vadd.f32 %v1106_v13, %v1091_v9  ;;  %v1134_v28 = vmul.f32 %v1802_v35, %v1093_v22 }
 0x371   : > { %994 = vst [vmem:[%s2418_s21 + $0x60] sm:$0xff] %v962_v20  ;;  %v1092_v23 = vsel %vm1044_vm13, %v962_v20, 0.0 }
 0x372   : > { %v1108_v25 = vadd.f32 %v1107_v21, %v1092_v23  ;;  %v1133_v26 = vmul.f32 %v1092_v23, %v962_v20  ;;  %v1147_v27 = vadd.f32 %v1146_v19, %v1132_v17  ;;  %v1805_v55 = vpop.f32.mrf.mxu1 }
 0x373   : > { %997 = vst [vmem:[%s2418_s21 + $0x78] sm:$0xff] %v1805_v55  ;;  %v1095_v30 = vsel %vm1047_vm14, %v1805_v55, 0.0 }
 0x374   : > { %v1148_v50 = vadd.f32 %v1147_v27, %v1133_v26  ;;  %v972_v56 = vpop.f32.mrf.mxu1  ;;  %v1109_v29 = vadd.f32 %v1108_v25, %v1093_v22  ;;  %v1136_v36 = vmul.f32 %v1805_v55, %v1095_v30 }
 0x375   : > { %996 = vst [vmem:[%s2418_s21 + $0x70] sm:$0xff] %v972_v56  ;;  %v1094_v31 = vsel %vm1046_vm15, %v972_v56, 0.0 }
 0x376   : > { %v1110_v62 = vadd.f32 %v1109_v29, %v1094_v31  ;;  %v1135_v33 = vmul.f32 %v1094_v31, %v972_v56  ;;  %v1149_v34 = vadd.f32 %v1148_v50, %v1134_v28 }
 0x378   : > { %v1111_v57 = vadd.f32 %v1110_v62, %v1095_v30  ;;  %v1150_v37 = vadd.f32 %v1149_v34, %v1135_v33 }
 0x37a   : > { %v1112_v38 = vrot.slane %v1111_v57, 4  ;;  %v1151_v6 = vadd.f32 %v1150_v37, %v1136_v36 }
 0x37c   : > { %v1113_v39 = vadd.f32 %v1112_v38, %v1111_v57  ;;  %v1152_v40 = vrot.slane %v1151_v6, 4 }
 0x37e   : > { %v1114_v2 = vrot.slane %v1113_v39, 2  ;;  %v1153_v41 = vadd.f32 %v1152_v40, %v1151_v6 }
 0x380   : > { %v1115_v43 = vadd.f32 %v1114_v2, %v1113_v39  ;;  %v1154_v44 = vrot.slane %v1153_v41, 2 }
 0x382   : > { %v1116_v14 = vrot.slane %v1115_v43, 1  ;;  %v1155_v46 = vadd.f32 %v1154_v44, %v1153_v41 }
 0x384   : > { %v1117_v10 = vadd.f32 %v1116_v14, %v1115_v43  ;;  %v1156_v49 = vrot.slane %v1155_v46, 1 }
 0x386   : > { %v1118_v51 = vadd.f32 %v1117_v10, %v1096_v48  ;;  %v1157_v18 = vadd.f32 %v1156_v49, %v1155_v46 }
 0x388   : > { %1119 = vst [vmem:[#allocation2 + $0x4] sm:$0x1] %v1118_v51  ;;  %v1158_v52 = vadd.f32 %v1157_v18, %v1120_v24 }
 0x38a   : > { %1159 = vst [vmem:[#allocation2 + $0x5] sm:$0x1] %v1158_v52 }
 0x38b PF: > { %p1516_p11 = scmp.ne.s32.totalorder %s2183_s16, 8 }
 0x38d   : > { %1163 = sbr.rel (%p1516_p11) target bundleno = 946 (0x3b2), region = 68 }
 0x392   : > { %v1164_v32 = vld [vmem:[#allocation2 + $0x4] sm:$0x1]  ;;  %v1166_v54 = vld [vmem:[#allocation2 + $0x5] sm:$0x1]  ;;  %v1171_v63 = vld [vmem:[%s2649_s3 + $0x2] sm:$0x1] }
 0x393   : > { %v1165_v42 = vmul.f32 0.001953125, %v1164_v32  ;;  %v1167_v53 = vmul.f32 0.001953125, %v1166_v54  ;;  %v1176_v3 = vld [vmem:[%s2649_s3 + $0x3] sm:$0x1] }
 0x395   : > { %v1168_v59 = vmul.f32 %v1165_v42, %v1165_v42 }
 0x397   : > { %v1169_v60 = vsub.f32 %v1167_v53, %v1168_v59 }
 0x399   : > { %v1170_v58 = vmax.f32 %v1169_v60, 0.0 }
 0x39b   : > { %v1172_v61 = vadd.f32 1e-05, %v1170_v58 }
 0x39d   : > { %1955 = vrsqrt.f32 %v1172_v61 }
 0x3aa   : > { %v1956_v0 = vpop.eup %1955 }
 0x3ab   : > { %v1174_v1 = vmul.f32 %v1956_v0, %v1171_v63 }
 0x3ad   : > { %1175 = vst [vmem:[#allocation2 + $0x6] sm:$0x1] %v1174_v1  ;;  %v1177_v4 = vmul.f32 %v1174_v1, %v1165_v42 }
 0x3af   : > { %v1178_v5 = vsub.f32 %v1176_v3, %v1177_v4 }
 0x3b1   : > { %1179 = vst [vmem:[#allocation2 + $0x7] sm:$0x1] %v1178_v5 }
 0x3b2 PF: > { %1183 = sbr.rel (%p481_p6) target bundleno = 1009 (0x3f1), region = 72  ;;  %s1518_s26 = sadd.s32 (!%p481_p6), 4294967288, %s2183_s16 }
 0x3b3   : > { %s2475_s27 = sshll.u32 (!%p481_p6), %s1518_s26, 7 }
 0x3b4   : > { %s2480_s28 = scalar_lea.vmem (!%p481_p6), [#allocation9], %s2475_s27  ;;  %s2581_s29 = scalar_lea.vmem (!%p481_p6), [#allocation3], %s2475_s27 }
 0x3b7   : > { %v2477_v7 = vld [vmem:[#allocation2 + $0x6] ss:$0 sm:$0xff]  ;;  %v1188_v9 = vld [vmem:[%s2480_s28 + $0x8] sm:$0xff]  ;;  %v1189_v13 = vld [vmem:[%s2480_s28 + $0x10] sm:$0xff] }
 0x3b8   : > { %v1187_v45 = vld [vmem:[%s2480_s28] sm:$0xff]  ;;  %v1209_v12 = vmul.f32 %v2477_v7, %v1188_v9  ;;  %v1210_v47 = vmul.f32 %v2477_v7, %v1189_v13  ;;  %v1190_v15 = vld [vmem:[%s2480_s28 + $0x18] sm:$0xff]  ;;  %v1192_v21 = vld [vmem:[%s2480_s28 + $0x28] sm:$0xff] }
 0x3b9   : > { %v2483_v8 = vld [vmem:[#allocation2 + $0x7] ss:$0 sm:$0xff]  ;;  %v1208_v11 = vmul.f32 %v2477_v7, %v1187_v45  ;;  %v1211_v19 = vmul.f32 %v2477_v7, %v1190_v15  ;;  %v1213_v23 = vmul.f32 %v2477_v7, %v1192_v21  ;;  %v1193_v25 = vld [vmem:[%s2480_s28 + $0x30] sm:$0xff]  ;;  %v1194_v26 = vld [vmem:[%s2480_s28 + $0x38] sm:$0xff] }
 0x3ba   : > { %v1191_v35 = vld [vmem:[%s2480_s28 + $0x20] sm:$0xff]  ;;  %v2496_v17 = vadd.f32 %v2483_v8, %v1209_v12  ;;  %v2502_v22 = vadd.f32 %v2483_v8, %v1210_v47  ;;  %v1214_v31 = vmul.f32 %v2477_v7, %v1193_v25  ;;  %v1215_v62 = vmul.f32 %v2477_v7, %v1194_v26  ;;  %v1196_v33 = vld [vmem:[%s2480_s28 + $0x48] sm:$0xff]  ;;  %v1197_v37 = vld [vmem:[%s2480_s28 + $0x50] sm:$0xff] }
 0x3bb   : > { %v2493_v16 = vadd.f32 %v2483_v8, %v1208_v11  ;;  %v1212_v20 = vmul.f32 %v2477_v7, %v1191_v35  ;;  %v2510_v28 = vadd.f32 %v2483_v8, %v1211_v19  ;;  %v1195_v56 = vld [vmem:[%s2480_s28 + $0x40] sm:$0xff]  ;;  %v2518_v30 = vadd.f32 %v2483_v8, %v1213_v23  ;;  %v1198_v40 = vld [vmem:[%s2480_s28 + $0x58] sm:$0xff]  ;;  %v1200_v14 = vld [vmem:[%s2480_s28 + $0x68] sm:$0xff] }
 0x3bc   : > { %v1523_v55 = vmul.f32 -1.442695, %v2496_v17  ;;  %v1524_v29 = vmul.f32 -1.442695, %v2502_v22  ;;  %v1216_v57 = vmul.f32 %v2477_v7, %v1195_v56  ;;  %v2529_v6 = vadd.f32 %v2483_v8, %v1214_v31  ;;  %v1199_v44 = vld [vmem:[%s2480_s28 + $0x60] sm:$0xff]  ;;  %v1201_v49 = vld [vmem:[%s2480_s28 + $0x70] sm:$0xff] }
 0x3bd   : > { %v1522_v27 = vmul.f32 -1.442695, %v2493_v16  ;;  %v2513_v50 = vadd.f32 %v2483_v8, %v1212_v20  ;;  %v1525_v34 = vmul.f32 -1.442695, %v2510_v28  ;;  %v1527_v38 = vmul.f32 -1.442695, %v2518_v30 }
 0x3be   : > { %v2532_v39 = vadd.f32 %v2483_v8, %v1215_v62  ;;  %v2536_v2 = vadd.f32 %v2483_v8, %v1216_v57  ;;  %v1217_v41 = vmul.f32 %v2477_v7, %v1196_v33  ;;  %v1218_v43 = vmul.f32 %v2477_v7, %v1197_v37  ;;  %v1202_v42 = vld [vmem:[%s2480_s28 + $0x78] sm:$0xff] }
 0x3bf   : > { %1957 = vpow2.f32 %v1522_v27  ;;  %v1526_v36 = vmul.f32 -1.442695, %v2513_v50  ;;  %v1528_v46 = vmul.f32 -1.442695, %v2529_v6  ;;  %v1219_v10 = vmul.f32 %v2477_v7, %v1198_v40 }
 0x3c0   : > { %1959 = vpow2.f32 %v1523_v55  ;;  %v1529_v48 = vmul.f32 -1.442695, %v2532_v39  ;;  %v1530_v24 = vmul.f32 -1.442695, %v2536_v2  ;;  %v2548_v51 = vadd.f32 %v2483_v8, %v1217_v41 }
 0x3c1   : > { %1961 = vpow2.f32 %v1524_v29  ;;  %v2551_v18 = vadd.f32 %v2483_v8, %v1218_v43  ;;  %v2554_v52 = vadd.f32 %v2483_v8, %v1219_v10  ;;  %v1220_v32 = vmul.f32 %v2477_v7, %v1199_v44 }
 0x3c2   : > { %1963 = vpow2.f32 %v1525_v34  ;;  %v1221_v54 = vmul.f32 %v2477_v7, %v1200_v14  ;;  %v1531_v53 = vmul.f32 -1.442695, %v2548_v51  ;;  %v1222_v60 = vmul.f32 %v2477_v7, %v1201_v49 }
 0x3c3   : > { %1965 = vpow2.f32 %v1526_v36  ;;  %v1532_v59 = vmul.f32 -1.442695, %v2551_v18  ;;  %v1533_v58 = vmul.f32 -1.442695, %v2554_v52  ;;  %v2564_v61 = vadd.f32 %v2483_v8, %v1220_v32  ;;  %v1359_v32 = vld [vmem:[%s2581_s29 + $0x8] sm:$0xff] }
 0x3c4   : > { %1967 = vpow2.f32 %v1527_v38  ;;  %v2567_v63 = vadd.f32 %v2483_v8, %v1221_v54  ;;  %v2570_v0 = vadd.f32 %v2483_v8, %v1222_v60  ;;  %v1223_v1 = vmul.f32 %v2477_v7, %v1202_v42 }
 0x3c5   : > { %1969 = vpow2.f32 %v1528_v46  ;;  %v1534_v3 = vmul.f32 -1.442695, %v2564_v61 }
 0x3c6   : > { %1971 = vpow2.f32 %v1529_v48  ;;  %v1535_v4 = vmul.f32 -1.442695, %v2567_v63  ;;  %v1536_v5 = vmul.f32 -1.442695, %v2570_v0  ;;  %v2577_v45 = vadd.f32 %v2483_v8, %v1223_v1  ;;  %v1358_v48 = vld [vmem:[%s2581_s29] sm:$0xff]  ;;  %v1361_v1 = vld [vmem:[%s2581_s29 + $0x18] sm:$0xff] }
 0x3c7   : > { %1973 = vpow2.f32 %v1530_v24 }
 0x3c8   : > { %1975 = vpow2.f32 %v1531_v53  ;;  %v1537_v9 = vmul.f32 -1.442695, %v2577_v45  ;;  %v1360_v53 = vld [vmem:[%s2581_s29 + $0x10] sm:$0xff] }
 0x3c9   : > { %1977 = vpow2.f32 %v1532_v59 }
 0x3ca   : > { %1979 = vpow2.f32 %v1533_v58 }
 0x3cb   : > { %1981 = vpow2.f32 %v1534_v3 }
 0x3cc   : > { %v1958_v11 = vpop.eup %1957  ;;  %1983 = vpow2.f32 %v1535_v4 }
 0x3cd   : > { %v1960_v12 = vpop.eup %1959  ;;  %v1293_v13 = vadd.f32 1.0, %v1958_v11  ;;  %1985 = vpow2.f32 %v1536_v5  ;;  %v1362_v5 = vld [vmem:[%s2581_s29 + $0x20] sm:$0xff] }
 0x3ce   : > { %v1962_v7 = vpop.eup %1961  ;;  %v1294_v47 = vadd.f32 1.0, %v1960_v12  ;;  %1987 = vpow2.f32 %v1537_v9  ;;  %v1363_v12 = vld [vmem:[%s2581_s29 + $0x28] sm:$0xff] }
 0x3cf   : > { %v1964_v15 = vpop.eup %1963  ;;  %1989 = vrcp.f32 %v1293_v13  ;;  %v1295_v35 = vadd.f32 1.0, %v1962_v7 }
 0x3d0   : > { %v1966_v19 = vpop.eup %1965  ;;  %1991 = vrcp.f32 %v1294_v47  ;;  %v1296_v20 = vadd.f32 1.0, %v1964_v15  ;;  %v1364_v47 = vld [vmem:[%s2581_s29 + $0x30] sm:$0xff] }
 0x3d1   : > { %v1968_v8 = vpop.eup %1967  ;;  %1993 = vrcp.f32 %v1295_v35  ;;  %v1297_v21 = vadd.f32 1.0, %v1966_v19  ;;  %v1365_v19 = vld [vmem:[%s2581_s29 + $0x38] sm:$0xff] }
 0x3d2   : > { %v1970_v23 = vpop.eup %1969  ;;  %1995 = vrcp.f32 %v1296_v20  ;;  %v1298_v25 = vadd.f32 1.0, %v1968_v8 }
 0x3d3   : > { %v1972_v26 = vpop.eup %1971  ;;  %1997 = vrcp.f32 %v1297_v21  ;;  %v1299_v27 = vadd.f32 1.0, %v1970_v23  ;;  %v1366_v21 = vld [vmem:[%s2581_s29 + $0x40] sm:$0xff] }
 0x3d4   : > { %v1974_v55 = vpop.eup %1973  ;;  %1999 = vrcp.f32 %v1298_v25  ;;  %v1300_v56 = vadd.f32 1.0, %v1972_v26  ;;  %v1367_v26 = vld [vmem:[%s2581_s29 + $0x48] sm:$0xff] }
 0x3d5   : > { %v1976_v29 = vpop.eup %1975  ;;  %2001 = vrcp.f32 %v1299_v27  ;;  %v1301_v31 = vadd.f32 1.0, %v1974_v55 }
 0x3d6   : > { %v1978_v62 = vpop.eup %1977  ;;  %2003 = vrcp.f32 %v1300_v56  ;;  %v1302_v33 = vadd.f32 1.0, %v1976_v29  ;;  %v1368_v56 = vld [vmem:[%s2581_s29 + $0x50] sm:$0xff] }
 0x3d7   : > { %v1980_v34 = vpop.eup %1979  ;;  %2005 = vrcp.f32 %v1301_v31  ;;  %v1303_v36 = vadd.f32 1.0, %v1978_v62  ;;  %v1369_v62 = vld [vmem:[%s2581_s29 + $0x58] sm:$0xff] }
 0x3d8   : > { %v1982_v57 = vpop.eup %1981  ;;  %2007 = vrcp.f32 %v1302_v33  ;;  %v1304_v37 = vadd.f32 1.0, %v1980_v34 }
 0x3d9   : > { %v1984_v38 = vpop.eup %1983  ;;  %2009 = vrcp.f32 %v1303_v36  ;;  %v1305_v40 = vadd.f32 1.0, %v1982_v57  ;;  %v1370_v36 = vld [vmem:[%s2581_s29 + $0x60] sm:$0xff] }
 0x3da   : > { %v1986_v41 = vpop.eup %1985  ;;  %2011 = vrcp.f32 %v1304_v37  ;;  %v1306_v43 = vadd.f32 1.0, %v1984_v38  ;;  %v1371_v38 = vld [vmem:[%s2581_s29 + $0x68] sm:$0xff] }
 0x3db   : > { %v1988_v44 = vpop.eup %1987  ;;  %2013 = vrcp.f32 %v1305_v40  ;;  %v1307_v14 = vadd.f32 1.0, %v1986_v41 }
 0x3dc   : > { %v1990_v46 = vpop.eup %1989  ;;  %2015 = vrcp.f32 %v1306_v43  ;;  %v1308_v10 = vadd.f32 1.0, %v1988_v44  ;;  %v1372_v43 = vld [vmem:[%s2581_s29 + $0x70] sm:$0xff] }
 0x3dd   : > { %v1992_v49 = vpop.eup %1991  ;;  %v1341_v24 = vmul.f32 %v1990_v46, %v2493_v16  ;;  %2017 = vrcp.f32 %v1307_v14  ;;  %v1373_v46 = vld [vmem:[%s2581_s29 + $0x78] sm:$0xff] }
 0x3de   : > { %v1994_v54 = vpop.eup %1993  ;;  %v1342_v42 = vmul.f32 %v1992_v49, %v2496_v17  ;;  %2019 = vrcp.f32 %v1308_v10 }
 0x3df   : > { %v1996_v59 = vpop.eup %1995  ;;  %v1374_v60 = vadd.f32 %v1358_v48, %v1341_v24  ;;  %v1343_v58 = vmul.f32 %v1994_v54, %v2502_v22 }
 0x3e0   : > { %v1998_v3 = vpop.eup %1997  ;;  %v1375_v4 = vadd.f32 %v1359_v32, %v1342_v42  ;;  %v1344_v16 = vmul.f32 %v1996_v59, %v2510_v28 }
 0x3e1   : > { %v2000_v9 = vpop.eup %1999  ;;  %1390 = vst [vmem:[%s2480_s28] sm:$0xff] %v1374_v60  ;;  %v1376_v17 = vadd.f32 %v1360_v53, %v1343_v58  ;;  %v1345_v11 = vmul.f32 %v1998_v3, %v2513_v50 }
 0x3e2   : > { %v2002_v13 = vpop.eup %2001  ;;  %1391 = vst [vmem:[%s2480_s28 + $0x8] sm:$0xff] %v1375_v4  ;;  %v1377_v22 = vadd.f32 %v1361_v1, %v1344_v16  ;;  %v1346_v7 = vmul.f32 %v2000_v9, %v2518_v30 }
 0x3e3   : > { %v2004_v15 = vpop.eup %2003  ;;  %1392 = vst [vmem:[%s2480_s28 + $0x10] sm:$0xff] %v1376_v17  ;;  %v1378_v28 = vadd.f32 %v1362_v5, %v1345_v11  ;;  %v1347_v35 = vmul.f32 %v2002_v13, %v2529_v6 }
 0x3e4   : > { %v2006_v20 = vpop.eup %2005  ;;  %1393 = vst [vmem:[%s2480_s28 + $0x18] sm:$0xff] %v1377_v22  ;;  %v1379_v50 = vadd.f32 %v1363_v12, %v1346_v7  ;;  %v1348_v8 = vmul.f32 %v2004_v15, %v2532_v39 }
 0x3e5   : > { %v2008_v23 = vpop.eup %2007  ;;  %1394 = vst [vmem:[%s2480_s28 + $0x20] sm:$0xff] %v1378_v28  ;;  %v1380_v30 = vadd.f32 %v1364_v47, %v1347_v35  ;;  %v1349_v25 = vmul.f32 %v2006_v20, %v2536_v2 }
 0x3e6   : > { %v2010_v27 = vpop.eup %2009  ;;  %1395 = vst [vmem:[%s2480_s28 + $0x28] sm:$0xff] %v1379_v50  ;;  %v1381_v6 = vadd.f32 %v1365_v19, %v1348_v8  ;;  %v1350_v55 = vmul.f32 %v2008_v23, %v2548_v51 }
 0x3e7   : > { %v2012_v29 = vpop.eup %2011  ;;  %1396 = vst [vmem:[%s2480_s28 + $0x30] sm:$0xff] %v1380_v30  ;;  %v1382_v39 = vadd.f32 %v1366_v21, %v1349_v25  ;;  %v1351_v31 = vmul.f32 %v2010_v27, %v2551_v18 }
 0x3e8   : > { %v2014_v33 = vpop.eup %2013  ;;  %1397 = vst [vmem:[%s2480_s28 + $0x38] sm:$0xff] %v1381_v6  ;;  %v1383_v2 = vadd.f32 %v1367_v26, %v1350_v55  ;;  %v1352_v34 = vmul.f32 %v2012_v29, %v2554_v52 }
 0x3e9   : > { %v2016_v51 = vpop.eup %2015  ;;  %1398 = vst [vmem:[%s2480_s28 + $0x40] sm:$0xff] %v1382_v39  ;;  %v1384_v57 = vadd.f32 %v1368_v56, %v1351_v31  ;;  %v1353_v37 = vmul.f32 %v2014_v33, %v2564_v61 }
 0x3ea   : > { %v2018_v18 = vpop.eup %2017  ;;  %1399 = vst [vmem:[%s2480_s28 + $0x48] sm:$0xff] %v1383_v2  ;;  %v1385_v40 = vadd.f32 %v1369_v62, %v1352_v34  ;;  %v1354_v41 = vmul.f32 %v2016_v51, %v2567_v63 }
 0x3eb   : > { %v2020_v52 = vpop.eup %2019  ;;  %1400 = vst [vmem:[%s2480_s28 + $0x50] sm:$0xff] %v1384_v57  ;;  %v1386_v44 = vadd.f32 %v1370_v36, %v1353_v37  ;;  %v1355_v14 = vmul.f32 %v2018_v18, %v2570_v0 }
 0x3ec   : > { %1401 = vst [vmem:[%s2480_s28 + $0x58] sm:$0xff] %v1385_v40  ;;  %v1387_v48 = vadd.f32 %v1371_v38, %v1354_v41  ;;  %v1356_v61 = vmul.f32 %v2020_v52, %v2577_v45 }
 0x3ed   : > { %1402 = vst [vmem:[%s2480_s28 + $0x60] sm:$0xff] %v1386_v44  ;;  %v1388_v10 = vadd.f32 %v1372_v43, %v1355_v14 }
 0x3ee   : > { %1403 = vst [vmem:[%s2480_s28 + $0x68] sm:$0xff] %v1387_v48  ;;  %v1389_v49 = vadd.f32 %v1373_v46, %v1356_v61 }
 0x3ef   : > { %1404 = vst [vmem:[%s2480_s28 + $0x70] sm:$0xff] %v1388_v10 }
 0x3f0   : > { %1405 = vst [vmem:[%s2480_s28 + $0x78] sm:$0xff] %v1389_v49 }
 0x3f1 PF: > { %p1870_p10 = scmp.eq.s32.totalorder %s2183_s16, 11  ;;  %s2149_s30 = smov [#allocation9]  }
 0x3f2   : > { %s1412_s5 = sshll.u32 %s2149_s30, 4  ;;  %s1413_s5 = int_to_ptr.vmem [resolvable:$true] %s1412_s5 }
 0x3f3   : > { %s2099_s6 = scalar_lea.vmem %s1413_s5, 8192  ;;  %p2106_p2 = scmp.lt.s32.totalorder %s1413_s5, %s1413_s5 }
 0x3f4   : > { %p2100_p12 = scmp.ne.s32.totalorder %s1413_s5, %s2099_s6  ;;  %p2107_p1 = scmp.lt.s32.totalorder %s2099_s6, %s2099_s6 }
 0x3f6   : > { %p2101_p13 = pnand %p2100_p12, %p1870_p10  ;;  %p2108_p5 = por %p2107_p1, %p2106_p2 }
 0x3f8   : > { %p2102_p0 = pneg %p2101_p13 }
 0x3fa   : > { %p2109_p8 = pnand %p2108_p5, %p2102_p0 }
 0x3fc   : > { %2112 = shalt.err (!%p2109_p8)
}
 0x3fd   : > { %s2150_s7 = smov 128   ;;  %s2151_s8 = smov 8  }
 0x3fe   : > { %1851 = dma.vmem_to_hbm [thread:$0]  (%p1870_p10), %s1413_s5, 8192, %s2650_s4, [#allocation5], %s2150_s7, %s2150_s7, %s2151_s8  }
 0x3ff   : > { %2136 = dma.done.wait (%p1870_p10), [#allocation5], 8192  }
 0x400   : > { %2138 = vsyncadd (%p1870_p10), [#allocation5], 4294959104 }
 0x401 PF: > { %s17_s15 = sadd.s32 1, %s2141_s15  }
 0x402   : > { %p14_p7 = scmp.ge.s32.totalorder %s17_s15, 14  }
 0x404   :  { %16 = sbr.rel (!%p14_p7) target bundleno = 3 (0x3), region = 102 }
 0x409   :  { %1428 = vsyncpa [#allocation4], 1 }
 0x40a   :  { %1430 = vsyncpa [#allocation4 + $0x1], 1 }
 0x40b   :  { %1431 = vsyncpa [#allocation7], 1 }
 0x40c   :  { %1432 = vsyncpa [#allocation5], 1 }
 0x40d   :  { %1434 = vsyncpa [#allocation5 + $0x1], 1 }

</bundles_post_ra>
